<compile_context>
chip_gen: v7x
topology: tpu7x:2x2x1
jax: 0.10.0
libtpu: 0.0.40
codegen_flags: <defaults>
</compile_context>

<pallas_src>
import math
import jax
import jax.numpy as jnp
from jax.experimental import pallas as pl
from jax.experimental.pallas import tpu as pltpu

# Module constants (from the PyTorch source).
d_k = d_v = 64
d_model = 768
n_heads = 12


# ---------------------------------------------------------------------------
# Fused MHA kernel: one grid step per (batch, head)
# ---------------------------------------------------------------------------
def _mha_kernel(q_in_ref, k_in_ref, v_in_ref,
                wq_ref, wk_ref, wv_ref,
                bq_ref, bk_ref, bv_ref,
                wo_ref, bo_ref,
                mask_ref, gamma_ref, beta_ref,
                out_ref, attn_ref,
                acc_ref):
    h = pl.program_id(1)
    nh = pl.num_programs(1)

    @pl.when(h == 0)
    def _():
        acc_ref[...] = jnp.zeros_like(acc_ref)

    x_q = q_in_ref[0]                      # (S, d_model); also the residual
    x_k = k_in_ref[0]
    x_v = v_in_ref[0]

    # Per-head projections (S, d_model) @ (d_model, d_k).  Fold 1/sqrt(d_k) into q
    # (S*d_k scale instead of an S*S scale on the scores).
    scale = jnp.float32(1.0 / math.sqrt(d_k))
    q = (jnp.dot(x_q, wq_ref[0], preferred_element_type=jnp.float32) + bq_ref[0]) * scale
    k = jnp.dot(x_k, wk_ref[0], preferred_element_type=jnp.float32) + bk_ref[0]
    v = jnp.dot(x_v, wv_ref[0], preferred_element_type=jnp.float32) + bv_ref[0]

    # scores = q @ k^T without materializing an explicit K transpose.
    scores = jax.lax.dot_general(
        q, k, dimension_numbers=(((1,), (1,)), ((), ())),
        preferred_element_type=jnp.float32)

    mask = mask_ref[0]                     # (S, S), nonzero where the key is padding
    scores = jnp.where(mask != 0.0, jnp.float32(-1e9), scores)

    # Numerically-stable softmax; normalize via per-row reciprocal + multiply.
    m = jnp.max(scores, axis=-1, keepdims=True)
    e = jnp.exp(scores - m)
    l = jnp.sum(e, axis=-1, keepdims=True)
    inv_l = pl.reciprocal(l)               # approx=True -> EUP slot, if 1e-4 parity not needed
    attn = e * inv_l
    attn_ref[0, 0] = attn                  # (B, H, S, S) output, written per (b, h)

    ctx = jnp.dot(attn, v, preferred_element_type=jnp.float32)          # (S, d_v)
    # Output projection, accumulated over heads in VMEM.
    acc_ref[...] += jnp.dot(ctx, wo_ref[0], preferred_element_type=jnp.float32)

    @pl.when(h == nh - 1)
    def _():
        # bias + residual + LayerNorm (eps = 1e-5, like torch.nn.LayerNorm)
        x = acc_ref[...] + bo_ref[...] + x_q
        mean = jnp.mean(x, axis=-1, keepdims=True)
        var = jnp.mean(jnp.square(x - mean), axis=-1, keepdims=True)
        out_ref[0] = (x - mean) * jax.lax.rsqrt(var + 1e-5) * gamma_ref[...] + beta_ref[...]


# ---------------------------------------------------------------------------
# Wrapper
# ---------------------------------------------------------------------------
def multi_head_attention(Q, K, V, attn_pad, p):
    B, S, _ = Q.shape

    # Parameter-only layout transforms (tiny, done once per call in XLA).
    wq = p["w_q"].reshape(d_model, n_heads, d_k).transpose(1, 0, 2)  # (H, d_model, d_k)
    wk = p["w_k"].reshape(d_model, n_heads, d_k).transpose(1, 0, 2)
    wv = p["w_v"].reshape(d_model, n_heads, d_v).transpose(1, 0, 2)
    wo = p["w_o"].reshape(n_heads, d_v, d_model)                      # pure reshape
    bq = p["b_q"].reshape(n_heads, 1, d_k)
    bk = p["b_k"].reshape(n_heads, 1, d_k)
    bv = p["b_v"].reshape(n_heads, 1, d_v)
    bo = p["b_o"].reshape(1, d_model)
    gamma = p["gamma"].reshape(1, d_model)
    beta = p["beta"].reshape(1, d_model)

    # Pad mask stays (B, S, S) -- indexed per batch, never duplicated per head.
    mask = attn_pad.astype(jnp.float32)

    out, attn = pl.pallas_call(
        _mha_kernel,
        out_shape=(
            jax.ShapeDtypeStruct((B, S, d_model), jnp.float32),
            jax.ShapeDtypeStruct((B, n_heads, S, S), jnp.float32),
        ),
        grid=(B, n_heads),
        in_specs=[
            pl.BlockSpec((1, S, d_model), lambda b, h: (b, 0, 0)),    # Q (and residual)
            pl.BlockSpec((1, S, d_model), lambda b, h: (b, 0, 0)),    # K
            pl.BlockSpec((1, S, d_model), lambda b, h: (b, 0, 0)),    # V
            pl.BlockSpec((1, d_model, d_k), lambda b, h: (h, 0, 0)),  # W_Q head slab
            pl.BlockSpec((1, d_model, d_k), lambda b, h: (h, 0, 0)),  # W_K head slab
            pl.BlockSpec((1, d_model, d_v), lambda b, h: (h, 0, 0)),  # W_V head slab
            pl.BlockSpec((1, 1, d_k), lambda b, h: (h, 0, 0)),        # b_Q head
            pl.BlockSpec((1, 1, d_k), lambda b, h: (h, 0, 0)),        # b_K head
            pl.BlockSpec((1, 1, d_v), lambda b, h: (h, 0, 0)),        # b_V head
            pl.BlockSpec((1, d_v, d_model), lambda b, h: (h, 0, 0)),  # W_O head slab
            pl.BlockSpec((1, d_model), lambda b, h: (0, 0)),          # b_O
            pl.BlockSpec((1, S, S), lambda b, h: (b, 0, 0)),          # pad mask (per batch)
            pl.BlockSpec((1, d_model), lambda b, h: (0, 0)),          # gamma
            pl.BlockSpec((1, d_model), lambda b, h: (0, 0)),          # beta
        ],
        out_specs=(
            pl.BlockSpec((1, S, d_model), lambda b, h: (b, 0, 0)),    # out: resident over h
            pl.BlockSpec((1, 1, S, S), lambda b, h: (b, h, 0, 0)),    # attn: per (b, h)
        ),
        scratch_shapes=[pltpu.VMEM((S, d_model), jnp.float32)],       # out-proj accumulator
        compiler_params=pltpu.CompilerParams(
            dimension_semantics=("parallel", "arbitrary")),
    )(Q, K, V, wq, wk, wv, bq, bk, bv, wo, bo, mask, gamma, beta)

    return out, attn


# ---------------------------------------------------------------------------
# Deterministic parameter init (nn.Linear-style uniform bounds)
# ---------------------------------------------------------------------------
def init_params(key):
    def lin(k, fan_in, fan_out):
        bound = 1.0 / math.sqrt(fan_in)
        kw, kb = jax.random.split(k)
        w = jax.random.uniform(kw, (fan_in, fan_out), jnp.float32, -bound, bound)
        b = jax.random.uniform(kb, (fan_out,), jnp.float32, -bound, bound)
        return w, b

    ks = jax.random.split(key, 4)
    w_q, b_q = lin(ks[0], d_model, n_heads * d_k)
    w_k, b_k = lin(ks[1], d_model, n_heads * d_k)
    w_v, b_v = lin(ks[2], d_model, n_heads * d_v)
    w_o, b_o = lin(ks[3], n_heads * d_v, d_model)
    return dict(
        w_q=w_q, b_q=b_q, w_k=w_k, b_k=b_k, w_v=w_v, b_v=b_v,
        w_o=w_o, b_o=b_o,
        gamma=jnp.ones((d_model,), jnp.float32),
        beta=jnp.zeros((d_model,), jnp.float32),
    )


# ---------------------------------------------------------------------------
# Pure-JAX reference (for correctness check)
# ---------------------------------------------------------------------------
def reference(Q, K, V, attn_pad, p):
    B, S, _ = Q.shape
    q_s = (Q @ p["w_q"] + p["b_q"]).reshape(B, S, n_heads, d_k).transpose(0, 2, 1, 3)
    k_s = (K @ p["w_k"] + p["b_k"]).reshape(B, S, n_heads, d_k).transpose(0, 2, 1, 3)
    v_s = (V @ p["w_v"] + p["b_v"]).reshape(B, S, n_heads, d_v).transpose(0, 2, 1, 3)
    scores = jnp.einsum("bhqd,bhkd->bhqk", q_s, k_s) / jnp.sqrt(jnp.float32(d_k))
    scores = jnp.where(attn_pad[:, None, :, :], jnp.float32(-1e9), scores)
    attn = jax.nn.softmax(scores, axis=-1)
    ctx = (
        jnp.einsum("bhqk,bhkd->bhqd", attn, v_s)
        .transpose(0, 2, 1, 3)
        .reshape(B, S, n_heads * d_v)
    )
    out = ctx @ p["w_o"] + p["b_o"] + Q
    mean = out.mean(-1, keepdims=True)
    var = jnp.square(out - mean).mean(-1, keepdims=True)
    out = (out - mean) * jax.lax.rsqrt(var + 1e-5) * p["gamma"] + p["beta"]
    return out, attn


if __name__ == "__main__":
    key = jax.random.PRNGKey(0)
    kp, kq, kk, kv = jax.random.split(key, 4)

    B, S = 2, 8  # small batch / seq; d_model, n_heads, d_k fixed by the module
    params = init_params(kp)
    Q = jax.random.normal(kq, (B, S, d_model), jnp.float32)
    K = jax.random.normal(kk, (B, S, d_model), jnp.float32)
    V = jax.random.normal(kv, (B, S, d_model), jnp.float32)

    # Pad mask: last 2 key positions of batch 1 are padding.
    seq_ids = jnp.arange(S)
    lengths = jnp.array([S, S - 2])
    attn_pad = jnp.broadcast_to((seq_ids[None, :] >= lengths[:, None])[:, None, :], (B, S, S))

    out, attn = multi_head_attention(Q, K, V, attn_pad, params)
    out = jax.block_until_ready(out)
    attn = jax.block_until_ready(attn)

    ref_out, ref_attn = reference(Q, K, V, attn_pad, params)
    assert out.shape == (B, S, d_model) and attn.shape == (B, n_heads, S, S)
    assert jnp.allclose(out, ref_out, rtol=1e-4, atol=1e-4)
    assert jnp.allclose(attn, ref_attn, rtol=1e-4, atol=1e-5)

    print("KERNEL_OK")
</pallas_src>

<mosaic_0001>
module attributes {stable_mosaic.version = 11 : i64} {
  func.func @_mha_kernel(%arg0: i32, %arg1: i32, %arg2: memref<1x8x768xf32, #tpu.memory_space<vmem>>, %arg3: memref<1x8x768xf32, #tpu.memory_space<vmem>>, %arg4: memref<1x8x768xf32, #tpu.memory_space<vmem>>, %arg5: memref<1x768x64xf32, #tpu.memory_space<vmem>>, %arg6: memref<1x768x64xf32, #tpu.memory_space<vmem>>, %arg7: memref<1x768x64xf32, #tpu.memory_space<vmem>>, %arg8: memref<1x1x64xf32, #tpu.memory_space<vmem>>, %arg9: memref<1x1x64xf32, #tpu.memory_space<vmem>>, %arg10: memref<1x1x64xf32, #tpu.memory_space<vmem>>, %arg11: memref<1x64x768xf32, #tpu.memory_space<vmem>>, %arg12: memref<1x768xf32, #tpu.memory_space<vmem>>, %arg13: memref<1x8x8xf32, #tpu.memory_space<vmem>>, %arg14: memref<1x768xf32, #tpu.memory_space<vmem>>, %arg15: memref<1x768xf32, #tpu.memory_space<vmem>>, %arg16: memref<1x8x768xf32, #tpu.memory_space<vmem>>, %arg17: memref<1x1x8x8xf32, #tpu.memory_space<vmem>>, %arg18: memref<8x768xf32, #tpu.memory_space<vmem>>) attributes {dimension_semantics = [#tpu.dimension_semantics<parallel>, #tpu.dimension_semantics<arbitrary>], iteration_bounds = array<i64: 2, 12>, scalar_prefetch = 0 : i64, scratch_operands = 1 : i64, tpu.core_type = #tpu.core_type<tc>, window_params = [{transform_indices = @transform_0, window_bounds = array<i64: 1, 8, 768>}, {transform_indices = @transform_1, window_bounds = array<i64: 1, 8, 768>}, {transform_indices = @transform_2, window_bounds = array<i64: 1, 8, 768>}, {transform_indices = @transform_3, window_bounds = array<i64: 1, 768, 64>}, {transform_indices = @transform_4, window_bounds = array<i64: 1, 768, 64>}, {transform_indices = @transform_5, window_bounds = array<i64: 1, 768, 64>}, {transform_indices = @transform_6, window_bounds = array<i64: 1, 1, 64>}, {transform_indices = @transform_7, window_bounds = array<i64: 1, 1, 64>}, {transform_indices = @transform_8, window_bounds = array<i64: 1, 1, 64>}, {transform_indices = @transform_9, window_bounds = array<i64: 1, 64, 768>}, {pipeline_mode = #tpu.pipeline_mode<synchronous>, transform_indices = @transform_10, window_bounds = array<i64: 1, 768>}, {transform_indices = @transform_11, window_bounds = array<i64: 1, 8, 8>}, {pipeline_mode = #tpu.pipeline_mode<synchronous>, transform_indices = @transform_12, window_bounds = array<i64: 1, 768>}, {pipeline_mode = #tpu.pipeline_mode<synchronous>, transform_indices = @transform_13, window_bounds = array<i64: 1, 768>}, {transform_indices = @transform_14, window_bounds = array<i64: 1, 8, 768>}, {transform_indices = @transform_15, window_bounds = array<i64: 1, 1, 8, 8>}]} {
    %c0_i32 = arith.constant 0 : i32
    %0 = arith.cmpi eq, %arg1, %c0_i32 : i32
    %1 = arith.extui %0 : i1 to i32
    %c0_i32_0 = arith.constant 0 : i32
    %2 = arith.cmpi ne, %1, %c0_i32_0 : i32
    scf.if %2 {
      %cst_52 = arith.constant 0.000000e+00 : f32
      %62 = vector.broadcast %cst_52 : f32 to vector<8x768xf32>
      %c0_53 = arith.constant 0 : index
      %c0_54 = arith.constant 0 : index
      %63 = vector.load %arg18[%c0_53, %c0_54] : memref<8x768xf32, #tpu.memory_space<vmem>>, vector<8x768xf32>
      tpu.vector_store %arg18[%c0_53, %c0_54], %62 {strides = array<i32>} : memref<8x768xf32, #tpu.memory_space<vmem>>, vector<8x768xf32>,
    } else {
    }
    %c0 = arith.constant 0 : index
    %c0_1 = arith.constant 0 : index
    %c0_2 = arith.constant 0 : index
    %3 = vector.load %arg2[%c0, %c0_1, %c0_2] : memref<1x8x768xf32, #tpu.memory_space<vmem>>, vector<1x8x768xf32>
    %4 = vector.shape_cast %3 : vector<1x8x768xf32> to vector<8x768xf32>
    %c0_3 = arith.constant 0 : index
    %c0_4 = arith.constant 0 : index
    %c0_5 = arith.constant 0 : index
    %5 = vector.load %arg3[%c0_3, %c0_4, %c0_5] : memref<1x8x768xf32, #tpu.memory_space<vmem>>, vector<1x8x768xf32>
    %6 = vector.shape_cast %5 : vector<1x8x768xf32> to vector<8x768xf32>
    %c0_6 = arith.constant 0 : index
    %c0_7 = arith.constant 0 : index
    %c0_8 = arith.constant 0 : index
    %7 = vector.load %arg4[%c0_6, %c0_7, %c0_8] : memref<1x8x768xf32, #tpu.memory_space<vmem>>, vector<1x8x768xf32>
    %8 = vector.shape_cast %7 : vector<1x8x768xf32> to vector<8x768xf32>
    %c0_9 = arith.constant 0 : index
    %c0_10 = arith.constant 0 : index
    %c0_11 = arith.constant 0 : index
    %9 = vector.load %arg5[%c0_9, %c0_10, %c0_11] : memref<1x768x64xf32, #tpu.memory_space<vmem>>, vector<1x768x64xf32>
    %10 = vector.shape_cast %9 : vector<1x768x64xf32> to vector<768x64xf32>
    %cst = arith.constant dense<0.000000e+00> : vector<8x64xf32>
    %11 = tpu.matmul %4, %10, %cst {dimension_numbers = #tpu.dot_dimension_numbers<[1], [0], [0], [1], [0, 0, 1, 1], [], []>} : vector<8x768xf32>, vector<768x64xf32>, vector<8x64xf32> -> vector<8x64xf32>
    %c0_12 = arith.constant 0 : index
    %c0_13 = arith.constant 0 : index
    %c0_14 = arith.constant 0 : index
    %12 = vector.load %arg8[%c0_12, %c0_13, %c0_14] : memref<1x1x64xf32, #tpu.memory_space<vmem>>, vector<1x1x64xf32>
    %13 = vector.shape_cast %12 : vector<1x1x64xf32> to vector<1x64xf32>
    %14 = vector.broadcast %13 : vector<1x64xf32> to vector<8x64xf32>
    %15 = arith.addf %11, %14 : vector<8x64xf32>
    %cst_15 = arith.constant 1.250000e-01 : f32
    %16 = vector.broadcast %cst_15 : f32 to vector<8x64xf32>
    %17 = arith.mulf %15, %16 : vector<8x64xf32>
    %c0_16 = arith.constant 0 : index
    %c0_17 = arith.constant 0 : index
    %c0_18 = arith.constant 0 : index
    %18 = vector.load %arg6[%c0_16, %c0_17, %c0_18] : memref<1x768x64xf32, #tpu.memory_space<vmem>>, vector<1x768x64xf32>
    %19 = vector.shape_cast %18 : vector<1x768x64xf32> to vector<768x64xf32>
    %cst_19 = arith.constant dense<0.000000e+00> : vector<8x64xf32>
    %20 = tpu.matmul %6, %19, %cst_19 {dimension_numbers = #tpu.dot_dimension_numbers<[1], [0], [0], [1], [0, 0, 1, 1], [], []>} : vector<8x768xf32>, vector<768x64xf32>, vector<8x64xf32> -> vector<8x64xf32>
    %c0_20 = arith.constant 0 : index
    %c0_21 = arith.constant 0 : index
    %c0_22 = arith.constant 0 : index
    %21 = vector.load %arg9[%c0_20, %c0_21, %c0_22] : memref<1x1x64xf32, #tpu.memory_space<vmem>>, vector<1x1x64xf32>
    %22 = vector.shape_cast %21 : vector<1x1x64xf32> to vector<1x64xf32>
    %23 = vector.broadcast %22 : vector<1x64xf32> to vector<8x64xf32>
    %24 = arith.addf %20, %23 : vector<8x64xf32>
    %c0_23 = arith.constant 0 : index
    %c0_24 = arith.constant 0 : index
    %c0_25 = arith.constant 0 : index
    %25 = vector.load %arg7[%c0_23, %c0_24, %c0_25] : memref<1x768x64xf32, #tpu.memory_space<vmem>>, vector<1x768x64xf32>
    %26 = vector.shape_cast %25 : vector<1x768x64xf32> to vector<768x64xf32>
    %cst_26 = arith.constant dense<0.000000e+00> : vector<8x64xf32>
    %27 = tpu.matmul %8, %26, %cst_26 {dimension_numbers = #tpu.dot_dimension_numbers<[1], [0], [0], [1], [0, 0, 1, 1], [], []>} : vector<8x768xf32>, vector<768x64xf32>, vector<8x64xf32> -> vector<8x64xf32>
    %c0_27 = arith.constant 0 : index
    %c0_28 = arith.constant 0 : index
    %c0_29 = arith.constant 0 : index
    %28 = vector.load %arg10[%c0_27, %c0_28, %c0_29] : memref<1x1x64xf32, #tpu.memory_space<vmem>>, vector<1x1x64xf32>
    %29 = vector.shape_cast %28 : vector<1x1x64xf32> to vector<1x64xf32>
    %30 = vector.broadcast %29 : vector<1x64xf32> to vector<8x64xf32>
    %31 = arith.addf %27, %30 : vector<8x64xf32>
    %cst_30 = arith.constant dense<0.000000e+00> : vector<8x8xf32>
    %32 = tpu.matmul %17, %24, %cst_30 {dimension_numbers = #tpu.dot_dimension_numbers<[1], [1], [0], [0], [0, 0, 1, 0], [], []>} : vector<8x64xf32>, vector<8x64xf32>, vector<8x8xf32> -> vector<8x8xf32>
    %c0_31 = arith.constant 0 : index
    %c0_32 = arith.constant 0 : index
    %c0_33 = arith.constant 0 : index
    %33 = vector.load %arg13[%c0_31, %c0_32, %c0_33] : memref<1x8x8xf32, #tpu.memory_space<vmem>>, vector<1x8x8xf32>
    %34 = vector.shape_cast %33 : vector<1x8x8xf32> to vector<8x8xf32>
    %cst_34 = arith.constant 0.000000e+00 : f32
    %35 = vector.broadcast %cst_34 : f32 to vector<8x8xf32>
    %36 = arith.cmpf one, %34, %35 : vector<8x8xf32>
    %cst_35 = arith.constant -1.000000e+09 : f32
    %37 = vector.broadcast %cst_35 : f32 to vector<8x8xf32>
    %38 = arith.select %36, %37, %32 : vector<8x8xi1>, vector<8x8xf32>
    %cst_36 = arith.constant dense<0xFF800000> : vector<8xf32>
    %39 = vector.multi_reduction <maximumf>, %38, %cst_36 [1] : vector<8x8xf32> to vector<8xf32>
    %40 = vector.shape_cast %39 : vector<8xf32> to vector<8x1xf32>
    %41 = vector.broadcast %40 : vector<8x1xf32> to vector<8x8xf32>
    %42 = arith.subf %38, %41 : vector<8x8xf32>
    %43 = math.exp %42 : vector<8x8xf32>
    %cst_37 = arith.constant dense<0.000000e+00> : vector<8xf32>
    %44 = vector.multi_reduction <add>, %43, %cst_37 [1] : vector<8x8xf32> to vector<8xf32>
    %45 = vector.shape_cast %44 : vector<8xf32> to vector<8x1xf32>
    %46 = tpu.reciprocal %45 : vector<8x1xf32> -> vector<8x1xf32>
    %47 = vector.broadcast %46 : vector<8x1xf32> to vector<8x8xf32>
    %48 = arith.mulf %43, %47 : vector<8x8xf32>
    %c0_38 = arith.constant 0 : index
    %c0_39 = arith.constant 0 : index
    %c0_40 = arith.constant 0 : index
    %c0_41 = arith.constant 0 : index
    %49 = vector.load %arg17[%c0_38, %c0_39, %c0_40, %c0_41] : memref<1x1x8x8xf32, #tpu.memory_space<vmem>>, vector<1x1x8x8xf32>
    %50 = vector.shape_cast %49 : vector<1x1x8x8xf32> to vector<8x8xf32>
    %51 = vector.shape_cast %48 : vector<8x8xf32> to vector<1x1x8x8xf32>
    tpu.vector_store %arg17[%c0_38, %c0_39, %c0_40, %c0_41], %51 {strides = array<i32>} : memref<1x1x8x8xf32, #tpu.memory_space<vmem>>, vector<1x1x8x8xf32>,
    %cst_42 = arith.constant dense<0.000000e+00> : vector<8x64xf32>
    %52 = tpu.matmul %48, %31, %cst_42 {dimension_numbers = #tpu.dot_dimension_numbers<[1], [0], [0], [1], [0, 0, 1, 1], [], []>} : vector<8x8xf32>, vector<8x64xf32>, vector<8x64xf32> -> vector<8x64xf32>
    %c0_43 = arith.constant 0 : index
    %c0_44 = arith.constant 0 : index
    %53 = vector.load %arg18[%c0_43, %c0_44] : memref<8x768xf32, #tpu.memory_space<vmem>>, vector<8x768xf32>
    %c0_45 = arith.constant 0 : index
    %c0_46 = arith.constant 0 : index
    %c0_47 = arith.constant 0 : index
    %54 = vector.load %arg11[%c0_45, %c0_46, %c0_47] : memref<1x64x768xf32, #tpu.memory_space<vmem>>, vector<1x64x768xf32>
    %55 = vector.shape_cast %54 : vector<1x64x768xf32> to vector<64x768xf32>
    %cst_48 = arith.constant dense<0.000000e+00> : vector<8x768xf32>
    %56 = tpu.matmul %52, %55, %cst_48 {dimension_numbers = #tpu.dot_dimension_numbers<[1], [0], [0], [1], [0, 0, 1, 1], [], []>} : vector<8x64xf32>, vector<64x768xf32>, vector<8x768xf32> -> vector<8x768xf32>
    %57 = arith.addf %53, %56 : vector<8x768xf32>
    %c0_49 = arith.constant 0 : index
    %c0_50 = arith.constant 0 : index
    %58 = vector.load %arg18[%c0_49, %c0_50] : memref<8x768xf32, #tpu.memory_space<vmem>>, vector<8x768xf32>
    tpu.vector_store %arg18[%c0_49, %c0_50], %57 {strides = array<i32>} : memref<8x768xf32, #tpu.memory_space<vmem>>, vector<8x768xf32>,
    %c11_i32 = arith.constant 11 : i32
    %59 = arith.cmpi eq, %arg1, %c11_i32 : i32
    %60 = arith.extui %59 : i1 to i32
    %c0_i32_51 = arith.constant 0 : i32
    %61 = arith.cmpi ne, %60, %c0_i32_51 : i32
    scf.if %61 {
      %c0_52 = arith.constant 0 : index
      %c0_53 = arith.constant 0 : index
      %62 = vector.load %arg18[%c0_52, %c0_53] : memref<8x768xf32, #tpu.memory_space<vmem>>, vector<8x768xf32>
      %c0_54 = arith.constant 0 : index
      %c0_55 = arith.constant 0 : index
      %63 = vector.load %arg12[%c0_54, %c0_55] : memref<1x768xf32, #tpu.memory_space<vmem>>, vector<1x768xf32>
      %64 = vector.broadcast %63 : vector<1x768xf32> to vector<8x768xf32>
      %65 = arith.addf %62, %64 : vector<8x768xf32>
      %66 = arith.addf %65, %4 : vector<8x768xf32>
      %cst_56 = arith.constant dense<0.000000e+00> : vector<8xf32>
      %67 = vector.multi_reduction <add>, %66, %cst_56 [1] : vector<8x768xf32> to vector<8xf32>
      %68 = vector.shape_cast %67 : vector<8xf32> to vector<8x1xf32>
      %cst_57 = arith.constant 7.680000e+02 : f32
      %69 = vector.broadcast %cst_57 : f32 to vector<8x1xf32>
      %70 = arith.divf %68, %69 : vector<8x1xf32>
      %71 = vector.broadcast %70 : vector<8x1xf32> to vector<8x768xf32>
      %72 = arith.subf %66, %71 : vector<8x768xf32>
      %73 = arith.mulf %72, %72 : vector<8x768xf32>
      %cst_58 = arith.constant dense<0.000000e+00> : vector<8xf32>
      %74 = vector.multi_reduction <add>, %73, %cst_58 [1] : vector<8x768xf32> to vector<8xf32>
      %75 = vector.shape_cast %74 : vector<8xf32> to vector<8x1xf32>
      %cst_59 = arith.constant 7.680000e+02 : f32
      %76 = vector.broadcast %cst_59 : f32 to vector<8x1xf32>
      %77 = arith.divf %75, %76 : vector<8x1xf32>
      %78 = vector.broadcast %70 : vector<8x1xf32> to vector<8x768xf32>
      %79 = arith.subf %66, %78 : vector<8x768xf32>
      %cst_60 = arith.constant 9.99999974E-6 : f32
      %80 = vector.broadcast %cst_60 : f32 to vector<8x1xf32>
      %81 = arith.addf %77, %80 : vector<8x1xf32>
      %82 = math.rsqrt %81 : vector<8x1xf32>
      %83 = vector.broadcast %82 : vector<8x1xf32> to vector<8x768xf32>
      %84 = arith.mulf %79, %83 : vector<8x768xf32>
      %c0_61 = arith.constant 0 : index
      %c0_62 = arith.constant 0 : index
      %85 = vector.load %arg14[%c0_61, %c0_62] : memref<1x768xf32, #tpu.memory_space<vmem>>, vector<1x768xf32>
      %86 = vector.broadcast %85 : vector<1x768xf32> to vector<8x768xf32>
      %87 = arith.mulf %84, %86 : vector<8x768xf32>
      %c0_63 = arith.constant 0 : index
      %c0_64 = arith.constant 0 : index
      %88 = vector.load %arg15[%c0_63, %c0_64] : memref<1x768xf32, #tpu.memory_space<vmem>>, vector<1x768xf32>
      %89 = vector.broadcast %88 : vector<1x768xf32> to vector<8x768xf32>
      %90 = arith.addf %87, %89 : vector<8x768xf32>
      %c0_65 = arith.constant 0 : index
      %c0_66 = arith.constant 0 : index
      %c0_67 = arith.constant 0 : index
      %91 = vector.load %arg16[%c0_65, %c0_66, %c0_67] : memref<1x8x768xf32, #tpu.memory_space<vmem>>, vector<1x8x768xf32>
      %92 = vector.shape_cast %91 : vector<1x8x768xf32> to vector<8x768xf32>
      %93 = vector.shape_cast %90 : vector<8x768xf32> to vector<1x8x768xf32>
      tpu.vector_store %arg16[%c0_65, %c0_66, %c0_67], %93 {strides = array<i32>} : memref<1x8x768xf32, #tpu.memory_space<vmem>>, vector<1x8x768xf32>,
    } else {
    }
    return
  }
  func.func @transform_0(%arg0: i32, %arg1: i32) -> (i32, i32, i32) {
    %c0_i32 = arith.constant 0 : i32
    %c0_i32_0 = arith.constant 0 : i32
    %c0_i32_1 = arith.constant 0 : i32
    return %arg0, %c0_i32, %c0_i32_0 : i32, i32, i32
  }
  func.func @transform_1(%arg0: i32, %arg1: i32) -> (i32, i32, i32) {
    %c0_i32 = arith.constant 0 : i32
    %c0_i32_0 = arith.constant 0 : i32
    %c0_i32_1 = arith.constant 0 : i32
    return %arg0, %c0_i32, %c0_i32_0 : i32, i32, i32
  }
  func.func @transform_2(%arg0: i32, %arg1: i32) -> (i32, i32, i32) {
    %c0_i32 = arith.constant 0 : i32
    %c0_i32_0 = arith.constant 0 : i32
    %c0_i32_1 = arith.constant 0 : i32
    return %arg0, %c0_i32, %c0_i32_0 : i32, i32, i32
  }
  func.func @transform_3(%arg0: i32, %arg1: i32) -> (i32, i32, i32) {
    %c0_i32 = arith.constant 0 : i32
    %c0_i32_0 = arith.constant 0 : i32
    %c0_i32_1 = arith.constant 0 : i32
    return %arg1, %c0_i32, %c0_i32_0 : i32, i32, i32
  }
  func.func @transform_4(%arg0: i32, %arg1: i32) -> (i32, i32, i32) {
    %c0_i32 = arith.constant 0 : i32
    %c0_i32_0 = arith.constant 0 : i32
    %c0_i32_1 = arith.constant 0 : i32
    return %arg1, %c0_i32, %c0_i32_0 : i32, i32, i32
  }
  func.func @transform_5(%arg0: i32, %arg1: i32) -> (i32, i32, i32) {
    %c0_i32 = arith.constant 0 : i32
    %c0_i32_0 = arith.constant 0 : i32
    %c0_i32_1 = arith.constant 0 : i32
    return %arg1, %c0_i32, %c0_i32_0 : i32, i32, i32
  }
  func.func @transform_6(%arg0: i32, %arg1: i32) -> (i32, i32, i32) {
    %c0_i32 = arith.constant 0 : i32
    %c0_i32_0 = arith.constant 0 : i32
    %c0_i32_1 = arith.constant 0 : i32
    return %arg1, %c0_i32, %c0_i32_0 : i32, i32, i32
  }
  func.func @transform_7(%arg0: i32, %arg1: i32) -> (i32, i32, i32) {
    %c0_i32 = arith.constant 0 : i32
    %c0_i32_0 = arith.constant 0 : i32
    %c0_i32_1 = arith.constant 0 : i32
    return %arg1, %c0_i32, %c0_i32_0 : i32, i32, i32
  }
  func.func @transform_8(%arg0: i32, %arg1: i32) -> (i32, i32, i32) {
    %c0_i32 = arith.constant 0 : i32
    %c0_i32_0 = arith.constant 0 : i32
    %c0_i32_1 = arith.constant 0 : i32
    return %arg1, %c0_i32, %c0_i32_0 : i32, i32, i32
  }
  func.func @transform_9(%arg0: i32, %arg1: i32) -> (i32, i32, i32) {
    %c0_i32 = arith.constant 0 : i32
    %c0_i32_0 = arith.constant 0 : i32
    %c0_i32_1 = arith.constant 0 : i32
    return %arg1, %c0_i32, %c0_i32_0 : i32, i32, i32
  }
  func.func @transform_10(%arg0: i32, %arg1: i32) -> (i32, i32) {
    %c0_i32 = arith.constant 0 : i32
    %c0_i32_0 = arith.constant 0 : i32
    %c0_i32_1 = arith.constant 0 : i32
    return %c0_i32, %c0_i32_0 : i32, i32
  }
  func.func @transform_11(%arg0: i32, %arg1: i32) -> (i32, i32, i32) {
    %c0_i32 = arith.constant 0 : i32
    %c0_i32_0 = arith.constant 0 : i32
    %c0_i32_1 = arith.constant 0 : i32
    return %arg0, %c0_i32, %c0_i32_0 : i32, i32, i32
  }
  func.func @transform_12(%arg0: i32, %arg1: i32) -> (i32, i32) {
    %c0_i32 = arith.constant 0 : i32
    %c0_i32_0 = arith.constant 0 : i32
    %c0_i32_1 = arith.constant 0 : i32
    return %c0_i32, %c0_i32_0 : i32, i32
  }
  func.func @transform_13(%arg0: i32, %arg1: i32) -> (i32, i32) {
    %c0_i32 = arith.constant 0 : i32
    %c0_i32_0 = arith.constant 0 : i32
    %c0_i32_1 = arith.constant 0 : i32
    return %c0_i32, %c0_i32_0 : i32, i32
  }
  func.func @transform_14(%arg0: i32, %arg1: i32) -> (i32, i32, i32) {
    %c0_i32 = arith.constant 0 : i32
    %c0_i32_0 = arith.constant 0 : i32
    %c0_i32_1 = arith.constant 0 : i32
    return %arg0, %c0_i32, %c0_i32_0 : i32, i32, i32
  }
  func.func @transform_15(%arg0: i32, %arg1: i32) -> (i32, i32, i32, i32) {
    %c0_i32 = arith.constant 0 : i32
    %c0_i32_0 = arith.constant 0 : i32
    %c0_i32_1 = arith.constant 0 : i32
    return %arg0, %arg1, %c0_i32, %c0_i32_0 : i32, i32, i32, i32
  }
}

</mosaic_0001>

<bundles_post_ra>
// kernel: tpu_custom_call.1
= control target key start
LH: loop header
LB: loop body
LE: loop exit
PB: predicated region body
PF: predicated region fallthrough
CT: control target
= control target key end

     0   :  { %s4150_s0 = inlined_call_operand.vmem [shape: f32[2,8,768], index: 0, kind: input, shape index: {}]   ;;  %s4151_s1 = inlined_call_operand.vmem [shape: f32[2,8,768], index: 1, kind: input, shape index: {}]   ;;  %s4152_s2 = inlined_call_operand.vmem [shape: f32[2,8,768], index: 2, kind: input, shape index: {}]   ;;  %s4153_s3 = inlined_call_operand.vmem [shape: f32[12,768,64], index: 3, kind: input, shape index: {}]   ;;  %s4154_s4 = inlined_call_operand.vmem [shape: f32[12,768,64], index: 4, kind: input, shape index: {}]   ;;  %s4155_s5 = inlined_call_operand.vmem [shape: f32[12,768,64], index: 5, kind: input, shape index: {}]   ;;  %s4156_s6 = inlined_call_operand.vmem [shape: f32[12,1,64], index: 6, kind: input, shape index: {}]   ;;  %s4157_s7 = inlined_call_operand.vmem [shape: f32[12,1,64], index: 7, kind: input, shape index: {}]   ;;  %s4158_s8 = inlined_call_operand.vmem [shape: f32[12,1,64], index: 8, kind: input, shape index: {}]   ;;  %s4159_s9 = inlined_call_operand.vmem [shape: f32[12,64,768], index: 9, kind: input, shape index: {}]   ;;  %s4160_s10 = inlined_call_operand.vmem [shape: f32[1,768], index: 10, kind: input, shape index: {}]   ;;  %s4161_s11 = inlined_call_operand.vmem [shape: f32[2,8,8], index: 11, kind: input, shape index: {}]   ;;  %s4162_s12 = inlined_call_operand.vmem [shape: f32[1,768], index: 12, kind: input, shape index: {}]   ;;  %s4163_s13 = inlined_call_operand.vmem [shape: f32[1,768], index: 13, kind: input, shape index: {}]   ;;  %s4164_s14 = inlined_call_operand.hbm [shape: f32[2,8,768], index: 14, kind: output, shape index: {0}]   ;;  %s4165_s15 = inlined_call_operand.vmem [shape: f32[2,12,8,8], index: 15, kind: output, shape index: {1}]  }
   0x1   :  { %4182 = sst [smem:[#allocation20_spill]] %s4150_s0 }
   0x2   :  { %4183 = sst [smem:[#allocation21_spill]] %s4151_s1 }
   0x3   :  { %4184 = sst [smem:[#allocation22_spill]] %s4152_s2 }
   0x4   :  { %4185 = sst [smem:[#allocation23_spill]] %s4153_s3 }
   0x5   :  { %4186 = sst [smem:[#allocation24_spill]] %s4154_s4 }
   0x6   :  { %4187 = sst [smem:[#allocation25_spill]] %s4155_s5 }
   0x7   :  { %4188 = sst [smem:[#allocation26_spill]] %s4160_s10 }
   0x8   :  { %4189 = sst [smem:[#allocation27_spill]] %s4162_s12 }
   0x9   :  { %4190 = sst [smem:[#allocation28_spill]] %s4163_s13 }
   0xa   :  { %4191 = sst [smem:[#allocation29_spill]] %s4164_s14 }
   0xb   :  { %21 = vsyncpa [#allocation4], 0 }
   0xc   :  { %23 = vsyncpa [#allocation4 + $0x1], 0  ;;  %s3496_s18 = smov 0   ;;  %s3498_s19 = smov 0  }
   0xd   :  { %s3500_s20 = smov 0   ;;  %s3502_s21 = smov 0  }
   0xe   :  { %s3504_s22 = smov 0   ;;  %s3506_s23 = smov 0  }
   0xf   :  { %s3508_s24 = smov 0   ;;  %s3510_s25 = smov 0  }
  0x10 LB: > { %4192 = sst [smem:[#allocation6_spill]] %s3382_s18  ;;  %s2537_s26 = sadd.s32 4294967295, %s3410_s25   ;;  %s3410_s25 = sphi %s3510_s25, %s29_s25   ;;  %s3406_s24 = sphi %s3508_s24, %s4236_s24   ;;  %s3402_s23 = sphi %s3506_s23, %s4235_s23   ;;  %s3398_s22 = sphi %s3504_s22, %s4234_s22   ;;  %s3394_s21 = sphi %s3502_s21, %s4233_s21   ;;  %s3390_s20 = sphi %s3500_s20, %s4232_s20   ;;  %s3386_s19 = sphi %s3498_s19, %s4231_s19   ;;  %s3382_s18 = sphi %s3496_s18, %s4230_s18  }
  0x11   : > { %4193 = sst [smem:[#allocation7_spill]] %s3386_s19  ;;  %s2538_s27 = sadd.s32 4294967294, %s3410_s25  }
  0x12   : > { %4194 = sst [smem:[#allocation8_spill]] %s3390_s20  ;;  %s38_s28 = sadd.s32 1, %s3402_s23 }
  0x13   : > { %4195 = sst [smem:[#allocation9_spill]] %s3394_s21  ;;  %p39_p0 = scmp.ge.s32.totalorder %s38_s28, 12 }
  0x14   : > { %4196 = sst [smem:[#allocation10_spill]] %s3398_s22  ;;  %s41_s29 = sadd.s32 1, %s3406_s24 }
  0x15   : > { %4197 = sst [smem:[#allocation11_spill]] %s3402_s23  ;;  %p407_p1 = scmp.ne.s32.totalorder %s3390_s20, %s3386_s19 }
  0x16   : > { %4198 = sst [smem:[#allocation12_spill]] %s3406_s24  ;;  %p408_p2 = scmp.eq.s32.totalorder %s2537_s26, 23 }
  0x17   : > { %4199 = sst [smem:[#allocation13_spill]] %s3410_s25  ;;  %s4238_s28 = smov (%p39_p0, %s38_s28), 0 }
  0x18   : > { %4200 = sst [smem:[#allocation14_spill]] %s4238_s28  ;;  %s4240_s29 = smov (!%p39_p0, %s41_s29), %s3406_s24 }
  0x19   : > { %p3545_p3 = por %p408_p2, %p407_p1  ;;  %p413_p4 = scmp.ne.s32.totalorder %s3386_s19, %s3382_s18 }
  0x1a   : > { %p43_p5 = scmp.ge.s32.totalorder %s4240_s29, 2  ;;  %p414_p6 = scmp.eq.s32.totalorder %s2538_s27, 23 }
  0x1b   : > { %s4201_s30 = scalar_select %p3545_p3, 1, 0 }
  0x1c   : > { %p2541_p7 = scmp.ge.s32.totalorder %s3410_s25, 1  ;;  %p550_p8 = scmp.lt.s32.totalorder %s3410_s25, 25 }
  0x1d   : > { %4202 = sst [smem:[#allocation15_spill]] %s4201_s30  ;;  %s4242_s29 = smov (%p43_p5, %s4240_s29), 0 }
  0x1e   : > { %4203 = sst [smem:[#allocation16_spill]] %s4242_s29  ;;  %p3555_p9 = por %p414_p6, %p413_p4 }
  0x1f   : > { %p551_p10 = pnand %p2541_p7, %p550_p8  ;;  %s394_s17 = ssub.s32 %s3406_s24, %s4242_s29 }
  0x20   : > { %s4204_s16 = scalar_select %p3555_p9, 1, 0 }
  0x21   : > { %s397_s26 = sadd.s32 1, %s3390_s20  ;;  %p395_p11 = scmp.eq.s32.totalorder %s394_s17, 0 }
  0x22   : > { %4205 = sst [smem:[#allocation17_spill]] %s4204_s16  ;;  %554 = sbr.rel (%p551_p10) target bundleno = 1725 (0x6bd), region = 76 }
  0x23   : > { %s3563_s28 = scalar_select %p395_p11, %s3390_s20, %s397_s26  }
  0x25   : > { %4206 = sst [smem:[#allocation18_spill]] %s3563_s28 }
  0x29   : > { %s4174_s27 = sand.u32 1, %s3386_s19   ;;  %p649_p12 = scmp.lt.s32.totalorder %s3398_s22, 1 }
  0x2a   : > { %s3230_s23 = smul.u32 48, %s4174_s27  ;;  %p664_p13 = scmp.lt.s32.totalorder %s3394_s21, 11 }
  0x2b   : > { %s650_s18 = scalar_select %p649_p12, %s3398_s22, 1 }
  0x2c   : > { %s3572_s29 = scalar_select %p664_p13, %s3394_s21, 11 }
  0x2d   : > { %s3231_s16 = smul.u32 48, %s650_s18  ;;  %s2549_s25 = sshll.u32 %s650_s18, 3 }
  0x2e   : > { %s4207_s0 = sld [smem:[#allocation20_spill]]  ;;  %s4209_s1 = sld [smem:[#allocation21_spill]] }
  0x2f   : > { %s4210_s2 = sld [smem:[#allocation22_spill]]  ;;  %s3232_s22 = smul.u32 768, %s3572_s29 }
  0x30   : > { %s4211_s3 = sld [smem:[#allocation23_spill]]  ;;  %s4212_s4 = sld [smem:[#allocation24_spill]] }
  0x31   : > { %s4213_s5 = sld [smem:[#allocation25_spill]]  ;;  %s687_s10 = scalar_lea.vmem %s4158_s8, %s3572_s29 }
  0x32   : > { %s3233_s12 = smul.u32 384, %s3572_s29  ;;  %s3621_s21 = scalar_lea.vmem %s4161_s11, %s2549_s25 }
  0x33   : > { %s3634_s17 = scalar_lea.vmem [#allocation3], %s3230_s23  ;;  %s4214_s26 = sld [smem:[#allocation9_spill]] }
  0x34   : > { %s3577_s24 = scalar_lea.vmem %s4207_s0, %s3231_s16  ;;  %s3582_s27 = scalar_lea.vmem %s4209_s1, %s3231_s16 }
  0x35   : > { %4208 = sst [smem:[#allocation19_spill]] %s3577_s24  ;;  %s3587_s19 = scalar_lea.vmem %s4210_s2, %s3231_s16 }
  0x36   : > { %s3601_s20 = scalar_lea.vmem %s4211_s3, %s3232_s22  ;;  %s3606_s14 = scalar_lea.vmem %s4212_s4, %s3232_s22 }
  0x37   : > { %s3611_s2 = scalar_lea.vmem %s4213_s5, %s3232_s22  ;;  %s3234_s24 = smul.u32 12, %s650_s18 }
  0x38   : > { %s3626_s28 = scalar_lea.vmem %s4159_s9, %s3233_s12 }
  0x39   : > { %s702_s4 = sadd.s32 %s3234_s24, %s3572_s29  ;;  %p2551_p0 = scmp.ne.s32.totalorder %s4214_s26, 0 }
  0x3a   : > { %s2550_s30 = sshll.u32 %s702_s4, 3  ;;  %v3412_v0 = vmov (!%p2551_p0), 0.0  }
  0x3b   : > { %s3632_s5 = scalar_lea.vmem %s4165_s15, %s2550_s30  ;;  %708 = sbr.rel (%p2551_p0) target bundleno = 66 (0x42), region = 80  ;;  %709 = vst [vmem:[#allocation2] sm:$0xff] (!%p2551_p0), %v3412_v0  ;;  %710 = vst [vmem:[#allocation2 + $0x8] sm:$0xff] (!%p2551_p0), %v3412_v0 }
  0x3c   : > { %711 = vst [vmem:[#allocation2 + $0x10] sm:$0xff] (!%p2551_p0), %v3412_v0  ;;  %712 = vst [vmem:[#allocation2 + $0x18] sm:$0xff] (!%p2551_p0), %v3412_v0 }
  0x3d   : > { %713 = vst [vmem:[#allocation2 + $0x20] sm:$0xff] (!%p2551_p0), %v3412_v0  ;;  %714 = vst [vmem:[#allocation2 + $0x28] sm:$0xff] (!%p2551_p0), %v3412_v0 }
  0x42 PF: > { %v749_v1 = vld [vmem:[%s3601_s20 + $0x80] sm:$0xff]  ;;  %v750_v2 = vld [vmem:[%s3601_s20 + $0x88] sm:$0xff]  ;;  %v751_v12 = vld [vmem:[%s3601_s20 + $0x90] sm:$0xff]  ;;  %s4215_s0 = sld [smem:[#allocation19_spill]]  ;;  %vm3414_vm0 = vmmov 0   ;;  %s4216_s4 = scalar_lea.vmem %s4156_s6, %s3572_s29  ;;  %vm1673_vm1 = vcmask 523264  }
  0x43   : > { %v733_v3 = vld [vmem:[%s3601_s20] sm:$0xff]  ;;  %v2894_v4 = vpack.c.bf16 %v750_v2, %v749_v1  ;;  %v734_v5 = vld [vmem:[%s3601_s20 + $0x8] sm:$0xff]  ;;  %v752_v14 = vld [vmem:[%s3601_s20 + $0x98] sm:$0xff]  ;;  %vm1753_vm3 = vcmask 64512  }
  0x44   : > { %v781_v6 = vld [vmem:[%s3601_s20 + $0x180] sm:$0xff]  ;;  %v782_v7 = vld [vmem:[%s3601_s20 + $0x188] sm:$0xff]  ;;  %v2896_v8 = vpack.c.bf16 %v734_v5, %v733_v3  ;;  %v735_v15 = vld [vmem:[%s3601_s20 + $0x10] sm:$0xff]  ;;  %v2898_v17 = vpack.c.bf16 %v752_v14, %v751_v12 }
  0x45   : > { %v2926_v9 = vpack.c.bf16 %v782_v7, %v781_v6  ;;  %v765_v10 = vld [vmem:[%s3601_s20 + $0x100] sm:$0xff]  ;;  %v766_v11 = vld [vmem:[%s3601_s20 + $0x108] sm:$0xff]  ;;  %2895 = vmatprep.subr.bf16.mxu0 %v2894_v4  ;;  %v736_v16 = vld [vmem:[%s3601_s20 + $0x18] sm:$0xff] }
  0x46   : > { %v2928_v13 = vpack.c.bf16 %v766_v11, %v765_v10  ;;  %2897 = vmatpush3.bf16.msra.mxu0 %v2896_v8  ;;  %v2900_v18 = vpack.c.bf16 %v736_v16, %v735_v15  ;;  %v783_v19 = vld [vmem:[%s3601_s20 + $0x190] sm:$0xff]  ;;  %v784_v20 = vld [vmem:[%s3601_s20 + $0x198] sm:$0xff]  ;;  %v753_v24 = vld [vmem:[%s3601_s20 + $0xa0] sm:$0xff] }
  0x47   : > { %2927 = vmatprep.subr.bf16.mxu1 %v2926_v9  ;;  %v767_v21 = vld [vmem:[%s3601_s20 + $0x110] sm:$0xff]  ;;  %v2930_v22 = vpack.c.bf16 %v784_v20, %v783_v19  ;;  %v768_v23 = vld [vmem:[%s3601_s20 + $0x118] sm:$0xff]  ;;  %v754_v25 = vld [vmem:[%s3601_s20 + $0xa8] sm:$0xff]  ;;  %2899 = vmatprep.subr.bf16.mxu0 %v2898_v17 }
  0x48   : > { %2929 = vmatpush3.bf16.msra.mxu1 %v2928_v13  ;;  %v2932_v26 = vpack.c.bf16 %v768_v23, %v767_v21  ;;  %v2902_v27 = vpack.c.bf16 %v754_v25, %v753_v24  ;;  %v737_v28 = vld [vmem:[%s3601_s20 + $0x20] sm:$0xff]  ;;  %v738_v29 = vld [vmem:[%s3601_s20 + $0x28] sm:$0xff]  ;;  %v755_v36 = vld [vmem:[%s3601_s20 + $0xb0] sm:$0xff] }
  0x49   : > { %v785_v30 = vld [vmem:[%s3601_s20 + $0x1a0] sm:$0xff]  ;;  %2931 = vmatprep.subr.bf16.mxu1 %v2930_v22  ;;  %v786_v31 = vld [vmem:[%s3601_s20 + $0x1a8] sm:$0xff]  ;;  %v2904_v34 = vpack.c.bf16 %v738_v29, %v737_v28  ;;  %v756_v37 = vld [vmem:[%s3601_s20 + $0xb8] sm:$0xff] }
  0x4a   : > { %v769_v32 = vld [vmem:[%s3601_s20 + $0x120] sm:$0xff]  ;;  %v770_v33 = vld [vmem:[%s3601_s20 + $0x128] sm:$0xff]  ;;  %2901 = vmatpush3.bf16.msra.mxu0 %v2900_v18  ;;  %v2934_v35 = vpack.c.bf16 %v786_v31, %v785_v30  ;;  %v739_v38 = vld [vmem:[%s3601_s20 + $0x30] sm:$0xff]  ;;  %v2906_v40 = vpack.c.bf16 %v756_v37, %v755_v36 }
  0x4b   : > { %2903 = vmatprep.subr.bf16.mxu0 %v2902_v27  ;;  %v2936_v39 = vpack.c.bf16 %v770_v33, %v769_v32  ;;  %v740_v41 = vld [vmem:[%s3601_s20 + $0x38] sm:$0xff]  ;;  %v787_v42 = vld [vmem:[%s3601_s20 + $0x1b0] sm:$0xff]  ;;  %v757_v47 = vld [vmem:[%s3601_s20 + $0xc0] sm:$0xff] }
  0x4c   : > { %2933 = vmatpush3.bf16.msra.mxu1 %v2932_v26  ;;  %v788_v43 = vld [vmem:[%s3601_s20 + $0x1b8] sm:$0xff]  ;;  %v771_v45 = vld [vmem:[%s3601_s20 + $0x130] sm:$0xff]  ;;  %v758_v48 = vld [vmem:[%s3601_s20 + $0xc8] sm:$0xff]  ;;  %v2908_v49 = vpack.c.bf16 %v740_v41, %v739_v38 }
  0x4d   : > { %2935 = vmatprep.subr.bf16.mxu1 %v2934_v35  ;;  %v2938_v44 = vpack.c.bf16 %v788_v43, %v787_v42  ;;  %v772_v46 = vld [vmem:[%s3601_s20 + $0x138] sm:$0xff]  ;;  %v789_v50 = vld [vmem:[%s3601_s20 + $0x1c0] sm:$0xff]  ;;  %v790_v51 = vld [vmem:[%s3601_s20 + $0x1c8] sm:$0xff]  ;;  %v2910_v53 = vpack.c.bf16 %v758_v48, %v757_v47 }
  0x4e   : > { %2905 = vmatpush3.bf16.msra.mxu0 %v2904_v34  ;;  %v2940_v52 = vpack.c.bf16 %v772_v46, %v771_v45  ;;  %v741_v54 = vld [vmem:[%s3601_s20 + $0x40] sm:$0xff]  ;;  %v742_v55 = vld [vmem:[%s3601_s20 + $0x48] sm:$0xff]  ;;  %v2942_v57 = vpack.c.bf16 %v790_v51, %v789_v50  ;;  %v759_v59 = vld [vmem:[%s3601_s20 + $0xd0] sm:$0xff] }
  0x4f   : > { %2907 = vmatprep.subr.bf16.mxu0 %v2906_v40  ;;  %v773_v56 = vld [vmem:[%s3601_s20 + $0x140] sm:$0xff]  ;;  %v774_v58 = vld [vmem:[%s3601_s20 + $0x148] sm:$0xff]  ;;  %v760_v60 = vld [vmem:[%s3601_s20 + $0xd8] sm:$0xff]  ;;  %v2912_v63 = vpack.c.bf16 %v742_v55, %v741_v54 }
  0x50   : > { %2937 = vmatpush3.bf16.msra.mxu1 %v2936_v39  ;;  %v791_v61 = vld [vmem:[%s3601_s20 + $0x1d0] sm:$0xff]  ;;  %v792_v62 = vld [vmem:[%s3601_s20 + $0x1d8] sm:$0xff]  ;;  %v2944_v0 = vpack.c.bf16 %v774_v58, %v773_v56  ;;  %v2914_v1 = vpack.c.bf16 %v760_v60, %v759_v59  ;;  %v761_v7 = vld [vmem:[%s3601_s20 + $0xe0] sm:$0xff] }
  0x51   : > { %2939 = vmatprep.subr.bf16.mxu1 %v2938_v44  ;;  %v743_v2 = vld [vmem:[%s3601_s20 + $0x50] sm:$0xff]  ;;  %v744_v3 = vld [vmem:[%s3601_s20 + $0x58] sm:$0xff]  ;;  %v2946_v5 = vpack.c.bf16 %v792_v62, %v791_v61  ;;  %v762_v8 = vld [vmem:[%s3601_s20 + $0xe8] sm:$0xff] }
  0x52   : > { %2909 = vmatpush3.bf16.msra.mxu0 %v2908_v49  ;;  %v775_v4 = vld [vmem:[%s3601_s20 + $0x150] sm:$0xff]  ;;  %v776_v6 = vld [vmem:[%s3601_s20 + $0x158] sm:$0xff]  ;;  %v793_v9 = vld [vmem:[%s3601_s20 + $0x1e0] sm:$0xff]  ;;  %v2916_v11 = vpack.c.bf16 %v744_v3, %v743_v2  ;;  %v2918_v15 = vpack.c.bf16 %v762_v8, %v761_v7 }
  0x53   : > { %2911 = vmatprep.subr.bf16.mxu0 %v2910_v53  ;;  %v794_v10 = vld [vmem:[%s3601_s20 + $0x1e8] sm:$0xff]  ;;  %v745_v12 = vld [vmem:[%s3601_s20 + $0x60] sm:$0xff]  ;;  %v2948_v14 = vpack.c.bf16 %v776_v6, %v775_v4  ;;  %v763_v20 = vld [vmem:[%s3601_s20 + $0xf0] sm:$0xff] }
  0x54   : > { %2941 = vmatpush3.bf16.msra.mxu1 %v2940_v52  ;;  %v746_v13 = vld [vmem:[%s3601_s20 + $0x68] sm:$0xff]  ;;  %v777_v16 = vld [vmem:[%s3601_s20 + $0x160] sm:$0xff]  ;;  %v2950_v19 = vpack.c.bf16 %v794_v10, %v793_v9  ;;  %v764_v21 = vld [vmem:[%s3601_s20 + $0xf8] sm:$0xff] }
  0x55   : > { %2943 = vmatprep.subr.bf16.mxu1 %v2942_v57  ;;  %v778_v17 = vld [vmem:[%s3601_s20 + $0x168] sm:$0xff]  ;;  %v3700_v22 = vld [vmem:[%s4215_s0 + $0x18] sm:$0xff]  ;;  %v795_v23 = vld [vmem:[%s3601_s20 + $0x1f0] sm:$0xff]  ;;  %v2920_v25 = vpack.c.bf16 %v746_v13, %v745_v12  ;;  %v2922_v27 = vpack.c.bf16 %v764_v21, %v763_v20 }
  0x56   : > { %2913 = vmatpush3.bf16.msra.mxu0 %v2912_v63  ;;  %v3694_v18 = vld [vmem:[%s4215_s0 + $0x8] sm:$0xff]  ;;  %v796_v24 = vld [vmem:[%s3601_s20 + $0x1f8] sm:$0xff]  ;;  %970 = vmatprep.mubr.f32.mxu1 %v3700_v22  ;;  %v2952_v26 = vpack.c.bf16 %v778_v17, %v777_v16  ;;  %v747_v28 = vld [vmem:[%s3601_s20 + $0x70] sm:$0xff] }
  0x57   : > { %2915 = vmatprep.subr.bf16.mxu0 %v2914_v1  ;;  %900 = vmatprep.mubr.f32.mxu0 %v3694_v18  ;;  %v748_v29 = vld [vmem:[%s3601_s20 + $0x78] sm:$0xff]  ;;  %v779_v30 = vld [vmem:[%s3601_s20 + $0x170] sm:$0xff]  ;;  %v2954_v31 = vpack.c.bf16 %v796_v24, %v795_v23  ;;  %v813_v33 = vld [vmem:[%s3601_s20 + $0x280] sm:$0xff] }
  0x58   : > { %2945 = vmatpush3.bf16.msra.mxu1 %v2944_v0  ;;  %v780_v32 = vld [vmem:[%s3601_s20 + $0x178] sm:$0xff]  ;;  %v814_v34 = vld [vmem:[%s3601_s20 + $0x288] sm:$0xff]  ;;  %v1063_v35 = vld [vmem:[%s3606_s14 + $0x80] sm:$0xff]  ;;  %v2924_v37 = vpack.c.bf16 %v748_v29, %v747_v28 }
  0x59   : > { %2947 = vmatprep.subr.bf16.mxu1 %v2946_v5  ;;  %v1064_v36 = vld [vmem:[%s3606_s14 + $0x88] sm:$0xff]  ;;  %v2956_v38 = vpack.c.bf16 %v780_v32, %v779_v30  ;;  %v2958_v39 = vpack.c.bf16 %v814_v34, %v813_v33  ;;  %v797_v40 = vld [vmem:[%s3601_s20 + $0x200] sm:$0xff]  ;;  %v815_v45 = vld [vmem:[%s3601_s20 + $0x290] sm:$0xff] }
  0x5a   : > { %2917 = vmatpush3.bf16.msra.mxu0 %v2916_v11  ;;  %v798_v41 = vld [vmem:[%s3601_s20 + $0x208] sm:$0xff]  ;;  %v1047_v42 = vld [vmem:[%s3606_s14] sm:$0xff]  ;;  %v2990_v43 = vpack.c.bf16 %v1064_v36, %v1063_v35  ;;  %v816_v46 = vld [vmem:[%s3601_s20 + $0x298] sm:$0xff] }
  0x5b   : > { %2919 = vmatprep.subr.bf16.mxu0 %v2918_v15  ;;  %v1048_v44 = vld [vmem:[%s3606_s14 + $0x8] sm:$0xff]  ;;  %v1065_v47 = vld [vmem:[%s3606_s14 + $0x90] sm:$0xff]  ;;  %v1066_v48 = vld [vmem:[%s3606_s14 + $0x98] sm:$0xff]  ;;  %v2960_v50 = vpack.c.bf16 %v798_v41, %v797_v40  ;;  %v2962_v53 = vpack.c.bf16 %v816_v46, %v815_v45 }
  0x5c   : > { %2949 = vmatpush3.bf16.msra.mxu1 %v2948_v14  ;;  %v3722_v49 = vld [vmem:[%s4215_s0] sm:$0xff]  ;;  %v3725_v51 = vld [vmem:[%s4215_s0 + $0x10] sm:$0xff]  ;;  %v2992_v52 = vpack.c.bf16 %v1048_v44, %v1047_v42  ;;  %v800_v55 = vld [vmem:[%s3601_s20 + $0x218] sm:$0xff]  ;;  %v2994_v57 = vpack.c.bf16 %v1066_v48, %v1065_v47 }
  0x5d   : > { %2951 = vmatprep.subr.bf16.mxu1 %v2950_v19  ;;  %v799_v54 = vld [vmem:[%s3601_s20 + $0x210] sm:$0xff]  ;;  %v1050_v58 = vld [vmem:[%s3606_s14 + $0x18] sm:$0xff]  ;;  %v817_v59 = vld [vmem:[%s3601_s20 + $0x2a0] sm:$0xff] }
  0x5e   : > { %2921 = vmatpush3.bf16.msra.mxu0 %v2920_v25  ;;  %v1049_v56 = vld [vmem:[%s3606_s14 + $0x10] sm:$0xff]  ;;  %v818_v60 = vld [vmem:[%s3601_s20 + $0x2a8] sm:$0xff]  ;;  %v1067_v61 = vld [vmem:[%s3606_s14 + $0xa0] sm:$0xff]  ;;  %v2964_v63 = vpack.c.bf16 %v800_v55, %v799_v54 }
  0x5f   : > { %2923 = vmatprep.subr.bf16.mxu0 %v2922_v27  ;;  %v1068_v62 = vld [vmem:[%s3606_s14 + $0xa8] sm:$0xff]  ;;  %v2996_v0 = vpack.c.bf16 %v1050_v58, %v1049_v56  ;;  %v2966_v1 = vpack.c.bf16 %v818_v60, %v817_v59  ;;  %v801_v2 = vld [vmem:[%s3601_s20 + $0x220] sm:$0xff]  ;;  %v819_v7 = vld [vmem:[%s3601_s20 + $0x2b0] sm:$0xff] }
  0x60   : > { %2953 = vmatpush3.bf16.msra.mxu1 %v2952_v26  ;;  %v802_v3 = vld [vmem:[%s3601_s20 + $0x228] sm:$0xff]  ;;  %v1051_v4 = vld [vmem:[%s3606_s14 + $0x20] sm:$0xff]  ;;  %v2998_v5 = vpack.c.bf16 %v1068_v62, %v1067_v61  ;;  %v820_v8 = vld [vmem:[%s3601_s20 + $0x2b8] sm:$0xff] }
  0x61   : > { %2955 = vmatprep.subr.bf16.mxu1 %v2954_v31  ;;  %v1052_v6 = vld [vmem:[%s3606_s14 + $0x28] sm:$0xff]  ;;  %v1069_v9 = vld [vmem:[%s3606_s14 + $0xb0] sm:$0xff]  ;;  %v1070_v10 = vld [vmem:[%s3606_s14 + $0xb8] sm:$0xff]  ;;  %v2968_v11 = vpack.c.bf16 %v802_v3, %v801_v2  ;;  %v2970_v13 = vpack.c.bf16 %v820_v8, %v819_v7 }
  0x62   : > { %2925 = vmatpush3.bf16.msra.mxu0 %v2924_v37  ;;  %v3000_v12 = vpack.c.bf16 %v1052_v6, %v1051_v4  ;;  %v803_v14 = vld [vmem:[%s3601_s20 + $0x230] sm:$0xff]  ;;  %v804_v15 = vld [vmem:[%s3601_s20 + $0x238] sm:$0xff]  ;;  %v3002_v17 = vpack.c.bf16 %v1070_v10, %v1069_v9  ;;  %v821_v20 = vld [vmem:[%s3601_s20 + $0x2c0] sm:$0xff] }
  0x63   : > { %2959 = vmatprep.subr.bf16.mxu0 %v2958_v39  ;;  %v1053_v16 = vld [vmem:[%s3606_s14 + $0x30] sm:$0xff]  ;;  %v1054_v19 = vld [vmem:[%s3606_s14 + $0x38] sm:$0xff]  ;;  %v822_v21 = vld [vmem:[%s3601_s20 + $0x2c8] sm:$0xff]  ;;  %v2972_v25 = vpack.c.bf16 %v804_v15, %v803_v14 }
  0x64   : > { %2957 = vmatpush3.bf16.msra.mxu1 %v2956_v38  ;;  %v1071_v23 = vld [vmem:[%s3606_s14 + $0xc0] sm:$0xff]  ;;  %v1072_v24 = vld [vmem:[%s3606_s14 + $0xc8] sm:$0xff]  ;;  %v3004_v28 = vpack.c.bf16 %v1054_v19, %v1053_v16  ;;  %v2974_v29 = vpack.c.bf16 %v822_v21, %v821_v20  ;;  %v823_v35 = vld [vmem:[%s3601_s20 + $0x2d0] sm:$0xff] }
  0x65   : > { %2991 = vmatprep.subr.bf16.mxu1 %v2990_v43  ;;  %901 = vmatmul.mubr.f32.vlgmr.msra.gmra.mrb[0].mxu0 %v3722_v49  ;;  %v805_v26 = vld [vmem:[%s3601_s20 + $0x240] sm:$0xff]  ;;  %v3755_v27 = vld [vmem:[%s4215_s0 + $0x28] sm:$0xff]  ;;  %v3006_v33 = vpack.c.bf16 %v1072_v24, %v1071_v23  ;;  %v824_v36 = vld [vmem:[%s3601_s20 + $0x2d8] sm:$0xff] }
  0x66   : > { %2961 = vmatpush3.bf16.msra.mxu0 %v2960_v50  ;;  %v806_v30 = vld [vmem:[%s3601_s20 + $0x248] sm:$0xff]  ;;  %v1055_v31 = vld [vmem:[%s3606_s14 + $0x40] sm:$0xff]  ;;  %1040 = vmatprep.mubr.f32.mxu0 %v3755_v27  ;;  %v1073_v37 = vld [vmem:[%s3606_s14 + $0xd0] sm:$0xff]  ;;  %v2978_v41 = vpack.c.bf16 %v824_v36, %v823_v35 }
  0x67   : > { %971 = vmatmul.mubr.f32.vlgmr.msra.gmra.mrb[0].mxu1 %v3725_v51  ;;  %2963 = vmatprep.subr.bf16.mxu0 %v2962_v53  ;;  %v722_v32 = vld [vmem:[%s3582_s27 + $0x8] sm:$0xff]  ;;  %v1074_v38 = vld [vmem:[%s3606_s14 + $0xd8] sm:$0xff]  ;;  %v2976_v39 = vpack.c.bf16 %v806_v30, %v805_v26  ;;  %v807_v42 = vld [vmem:[%s3601_s20 + $0x250] sm:$0xff] }
  0x68   : > { %2993 = vmatpush3.bf16.msra.mxu1 %v2992_v52  ;;  %v1056_v34 = vld [vmem:[%s3606_s14 + $0x48] sm:$0xff]  ;;  %1214 = vmatprep.mubr.f32.mxu1 %v722_v32  ;;  %v808_v43 = vld [vmem:[%s3601_s20 + $0x258] sm:$0xff]  ;;  %v1057_v44 = vld [vmem:[%s3606_s14 + $0x50] sm:$0xff]  ;;  %v3010_v45 = vpack.c.bf16 %v1074_v38, %v1073_v37 }
  0x69   : > { %2995 = vmatprep.subr.bf16.mxu1 %v2994_v57  ;;  %v3008_v40 = vpack.c.bf16 %v1056_v34, %v1055_v31  ;;  %v1058_v46 = vld [vmem:[%s3606_s14 + $0x58] sm:$0xff]  ;;  %v825_v47 = vld [vmem:[%s3601_s20 + $0x2e0] sm:$0xff]  ;;  %v826_v48 = vld [vmem:[%s3601_s20 + $0x2e8] sm:$0xff]  ;;  %v2980_v53 = vpack.c.bf16 %v808_v43, %v807_v42 }
  0x6a   : > { %2965 = vmatpush3.bf16.msra.mxu0 %v2964_v63  ;;  %v1075_v50 = vld [vmem:[%s3606_s14 + $0xe0] sm:$0xff]  ;;  %v1076_v52 = vld [vmem:[%s3606_s14 + $0xe8] sm:$0xff]  ;;  %v3012_v54 = vpack.c.bf16 %v1058_v46, %v1057_v44  ;;  %v2982_v55 = vpack.c.bf16 %v826_v48, %v825_v47  ;;  %v827_v61 = vld [vmem:[%s3601_s20 + $0x2f0] sm:$0xff] }
  0x6b   : > { %2967 = vmatprep.subr.bf16.mxu0 %v2966_v1  ;;  %v809_v56 = vld [vmem:[%s3601_s20 + $0x260] sm:$0xff]  ;;  %v810_v57 = vld [vmem:[%s3601_s20 + $0x268] sm:$0xff]  ;;  %v3014_v59 = vpack.c.bf16 %v1076_v52, %v1075_v50  ;;  %v828_v62 = vld [vmem:[%s3601_s20 + $0x2f8] sm:$0xff] }
  0x6c   : > { %2997 = vmatpush3.bf16.msra.mxu1 %v2996_v0  ;;  %v1059_v58 = vld [vmem:[%s3606_s14 + $0x60] sm:$0xff]  ;;  %v1060_v60 = vld [vmem:[%s3606_s14 + $0x68] sm:$0xff]  ;;  %v1077_v63 = vld [vmem:[%s3606_s14 + $0xf0] sm:$0xff]  ;;  %v2984_v1 = vpack.c.bf16 %v810_v57, %v809_v56  ;;  %v2986_v3 = vpack.c.bf16 %v828_v62, %v827_v61 }
  0x6d   : > { %2999 = vmatprep.subr.bf16.mxu1 %v2998_v5  ;;  %v1078_v0 = vld [vmem:[%s3606_s14 + $0xf8] sm:$0xff]  ;;  %v3016_v2 = vpack.c.bf16 %v1060_v60, %v1059_v58  ;;  %v811_v4 = vld [vmem:[%s3601_s20 + $0x270] sm:$0xff]  ;;  %v1095_v9 = vld [vmem:[%s3606_s14 + $0x180] sm:$0xff] }
  0x6e   : > { %2969 = vmatpush3.bf16.msra.mxu0 %v2968_v11  ;;  %v812_v5 = vld [vmem:[%s3601_s20 + $0x278] sm:$0xff]  ;;  %v1061_v6 = vld [vmem:[%s3606_s14 + $0x70] sm:$0xff]  ;;  %v3018_v7 = vpack.c.bf16 %v1078_v0, %v1077_v63  ;;  %v1096_v10 = vld [vmem:[%s3606_s14 + $0x188] sm:$0xff] }
  0x6f   : > { %2971 = vmatprep.subr.bf16.mxu0 %v2970_v13  ;;  %v1062_v8 = vld [vmem:[%s3606_s14 + $0x78] sm:$0xff]  ;;  %v1127_v11 = vld [vmem:[%s3606_s14 + $0x280] sm:$0xff]  ;;  %v2988_v13 = vpack.c.bf16 %v812_v5, %v811_v4  ;;  %v3022_v15 = vpack.c.bf16 %v1096_v10, %v1095_v9  ;;  %v1112_v21 = vld [vmem:[%s3606_s14 + $0x208] sm:$0xff] }
  0x70   : > { %3001 = vmatpush3.bf16.msra.mxu1 %v3000_v12  ;;  %v1128_v12 = vld [vmem:[%s3606_s14 + $0x288] sm:$0xff]  ;;  %v3020_v14 = vpack.c.bf16 %v1062_v8, %v1061_v6  ;;  %v1079_v16 = vld [vmem:[%s3606_s14 + $0x100] sm:$0xff]  ;;  %v1097_v23 = vld [vmem:[%s3606_s14 + $0x190] sm:$0xff] }
  0x71   : > { %3003 = vmatprep.subr.bf16.mxu1 %v3002_v17  ;;  %v1080_v17 = vld [vmem:[%s3606_s14 + $0x108] sm:$0xff]  ;;  %v1111_v19 = vld [vmem:[%s3606_s14 + $0x200] sm:$0xff]  ;;  %v3054_v20 = vpack.c.bf16 %v1128_v12, %v1127_v11  ;;  %v1098_v24 = vld [vmem:[%s3606_s14 + $0x198] sm:$0xff] }
  0x72   : > { %2973 = vmatpush3.bf16.msra.mxu0 %v2972_v25  ;;  %v1129_v25 = vld [vmem:[%s3606_s14 + $0x290] sm:$0xff]  ;;  %v1130_v26 = vld [vmem:[%s3606_s14 + $0x298] sm:$0xff]  ;;  %v721_v30 = vld [vmem:[%s3582_s27] sm:$0xff]  ;;  %v3056_v31 = vpack.c.bf16 %v1112_v21, %v1111_v19  ;;  %v3026_v32 = vpack.c.bf16 %v1098_v24, %v1097_v23 }
  0x73   : > { %2975 = vmatprep.subr.bf16.mxu0 %v2974_v29  ;;  %v3024_v29 = vpack.c.bf16 %v1080_v17, %v1079_v16  ;;  %v1082_v34 = vld [vmem:[%s3606_s14 + $0x118] sm:$0xff]  ;;  %v1113_v35 = vld [vmem:[%s3606_s14 + $0x210] sm:$0xff]  ;;  %v3058_v36 = vpack.c.bf16 %v1130_v26, %v1129_v25  ;;  %v1099_v38 = vld [vmem:[%s3606_s14 + $0x1a0] sm:$0xff] }
  0x74   : > { %3005 = vmatpush3.bf16.msra.mxu1 %v3004_v28  ;;  %v3799_v28 = vld [vmem:[%s4215_s0 + $0x20] sm:$0xff]  ;;  %v1114_v37 = vld [vmem:[%s3606_s14 + $0x218] sm:$0xff]  ;;  %v726_v44 = vld [vmem:[%s3582_s27 + $0x28] sm:$0xff] }
  0x75   : > { %3007 = vmatprep.subr.bf16.mxu1 %v3006_v33  ;;  %v1081_v33 = vld [vmem:[%s3606_s14 + $0x110] sm:$0xff]  ;;  %v724_v42 = vld [vmem:[%s3582_s27 + $0x18] sm:$0xff]  ;;  %v1083_v47 = vld [vmem:[%s3606_s14 + $0x120] sm:$0xff] }
  0x76   : > { %2977 = vmatpush3.bf16.msra.mxu0 %v2976_v39  ;;  %v1100_v39 = vld [vmem:[%s3606_s14 + $0x1a8] sm:$0xff]  ;;  %v3028_v43 = vpack.c.bf16 %v1082_v34, %v1081_v33  ;;  %v1115_v50 = vld [vmem:[%s3606_s14 + $0x220] sm:$0xff]  ;;  %v1133_v56 = vld [vmem:[%s3606_s14 + $0x2b0] sm:$0xff] }
  0x77   : > { %2979 = vmatprep.subr.bf16.mxu0 %v2978_v41  ;;  %v1132_v41 = vld [vmem:[%s3606_s14 + $0x2a8] sm:$0xff]  ;;  %v3030_v46 = vpack.c.bf16 %v1100_v39, %v1099_v38  ;;  %v1134_v57 = vld [vmem:[%s3606_s14 + $0x2b8] sm:$0xff]  ;;  %v1085_v61 = vld [vmem:[%s3606_s14 + $0x130] sm:$0xff] }
  0x78   : > { %3009 = vmatpush3.bf16.msra.mxu1 %v3008_v40  ;;  %v1131_v40 = vld [vmem:[%s3606_s14 + $0x2a0] sm:$0xff]  ;;  %v1084_v48 = vld [vmem:[%s3606_s14 + $0x128] sm:$0xff]  ;;  %v1086_v62 = vld [vmem:[%s3606_s14 + $0x138] sm:$0xff]  ;;  %v3066_v0 = vpack.c.bf16 %v1134_v57, %v1133_v56 }
  0x79   : > { %3011 = vmatprep.subr.bf16.mxu1 %v3010_v45  ;;  %v3060_v45 = vpack.c.bf16 %v1114_v37, %v1113_v35  ;;  %v3062_v52 = vpack.c.bf16 %v1132_v41, %v1131_v40  ;;  %v3032_v58 = vpack.c.bf16 %v1084_v48, %v1083_v47  ;;  %v1117_v63 = vld [vmem:[%s3606_s14 + $0x230] sm:$0xff]  ;;  %v1135_v4 = vld [vmem:[%s3606_s14 + $0x2c0] sm:$0xff]  ;;  %v1136_v5 = vld [vmem:[%s3606_s14 + $0x2c8] sm:$0xff]  ;;  %v3036_v6 = vpack.c.bf16 %v1086_v62, %v1085_v61 }
  0x7a   : > { %2981 = vmatpush3.bf16.msra.mxu0 %v2980_v53  ;;  %v1116_v53 = vld [vmem:[%s3606_s14 + $0x228] sm:$0xff]  ;;  %v1087_v9 = vld [vmem:[%s3606_s14 + $0x140] sm:$0xff]  ;;  %v3070_v12 = vpack.c.bf16 %v1136_v5, %v1135_v4  ;;  %v1137_v16 = vld [vmem:[%s3606_s14 + $0x2d0] sm:$0xff] }
  0x7b   : > { %2983 = vmatprep.subr.bf16.mxu0 %v2982_v55  ;;  %v1102_v55 = vld [vmem:[%s3606_s14 + $0x1b8] sm:$0xff]  ;;  %v1088_v10 = vld [vmem:[%s3606_s14 + $0x148] sm:$0xff]  ;;  %v1119_v11 = vld [vmem:[%s3606_s14 + $0x240] sm:$0xff] }
  0x7c   : > { %3013 = vmatpush3.bf16.msra.mxu1 %v3012_v54  ;;  %v1101_v54 = vld [vmem:[%s3606_s14 + $0x1b0] sm:$0xff]  ;;  %v1138_v17 = vld [vmem:[%s3606_s14 + $0x2d8] sm:$0xff]  ;;  %v3040_v19 = vpack.c.bf16 %v1088_v10, %v1087_v9  ;;  %v1140_v33 = vld [vmem:[%s3606_s14 + $0x2e8] sm:$0xff] }
  0x7d   : > { %3015 = vmatprep.subr.bf16.mxu1 %v3014_v59  ;;  %v3064_v59 = vpack.c.bf16 %v1116_v53, %v1115_v50  ;;  %v3034_v60 = vpack.c.bf16 %v1102_v55, %v1101_v54  ;;  %v1089_v23 = vld [vmem:[%s3606_s14 + $0x150] sm:$0xff]  ;;  %v1090_v24 = vld [vmem:[%s3606_s14 + $0x158] sm:$0xff]  ;;  %v3074_v26 = vpack.c.bf16 %v1138_v17, %v1137_v16  ;;  %v1091_v37 = vld [vmem:[%s3606_s14 + $0x160] sm:$0xff] }
  0x7e   : > { %2985 = vmatpush3.bf16.msra.mxu0 %v2984_v1  ;;  %v1118_v1 = vld [vmem:[%s3606_s14 + $0x238] sm:$0xff]  ;;  %v1121_v25 = vld [vmem:[%s3606_s14 + $0x250] sm:$0xff]  ;;  %v3044_v34 = vpack.c.bf16 %v1090_v24, %v1089_v23  ;;  %v1092_v38 = vld [vmem:[%s3606_s14 + $0x168] sm:$0xff] }
  0x7f   : > { %2987 = vmatprep.subr.bf16.mxu0 %v2986_v3  ;;  %v1104_v3 = vld [vmem:[%s3606_s14 + $0x1c8] sm:$0xff]  ;;  %v1123_v39 = vld [vmem:[%s3606_s14 + $0x260] sm:$0xff]  ;;  %v1093_v50 = vld [vmem:[%s3606_s14 + $0x170] sm:$0xff] }
  0x80   : > { %3017 = vmatpush3.bf16.msra.mxu1 %v3016_v2  ;;  %v1103_v2 = vld [vmem:[%s3606_s14 + $0x1c0] sm:$0xff]  ;;  %v1124_v41 = vld [vmem:[%s3606_s14 + $0x268] sm:$0xff]  ;;  %v1125_v54 = vld [vmem:[%s3606_s14 + $0x270] sm:$0xff] }
  0x81   : > { %3019 = vmatprep.subr.bf16.mxu1 %v3018_v7  ;;  %v3068_v7 = vpack.c.bf16 %v1118_v1, %v1117_v63  ;;  %v3038_v8 = vpack.c.bf16 %v1104_v3, %v1103_v2  ;;  %v3080_v47 = vpack.c.bf16 %v1124_v41, %v1123_v39  ;;  %v1126_v55 = vld [vmem:[%s3606_s14 + $0x278] sm:$0xff]  ;;  %v1377_v61 = vld [vmem:[%s3611_s2 + $0x88] sm:$0xff]  ;;  %v1360_v63 = vld [vmem:[%s3611_s2] sm:$0xff] }
  0x82   : > { %2989 = vmatpush3.bf16.msra.mxu0 %v2988_v13  ;;  %v1120_v13 = vld [vmem:[%s3606_s14 + $0x248] sm:$0xff]  ;;  %v3084_v57 = vpack.c.bf16 %v1126_v55, %v1125_v54  ;;  %v1378_v1 = vld [vmem:[%s3611_s2 + $0x90] sm:$0xff]  ;;  %v1379_v3 = vld [vmem:[%s3611_s2 + $0x98] sm:$0xff] }
  0x83   : > { %3023 = vmatprep.subr.bf16.mxu0 %v3022_v15  ;;  %v1106_v15 = vld [vmem:[%s3606_s14 + $0x1d8] sm:$0xff]  ;;  %v1362_v4 = vld [vmem:[%s3611_s2 + $0x10] sm:$0xff]  ;;  %v1372_v39 = vld [vmem:[%s3611_s2 + $0x60] sm:$0xff] }
  0x84   : > { %3021 = vmatpush3.bf16.msra.mxu1 %v3020_v14  ;;  %v1105_v14 = vld [vmem:[%s3606_s14 + $0x1d0] sm:$0xff]  ;;  %v1363_v5 = vld [vmem:[%s3611_s2 + $0x18] sm:$0xff] }
  0x85   : > { %3055 = vmatprep.subr.bf16.mxu1 %v3054_v20  ;;  %1041 = vmatmul.mubr.f32.vlgmr.msra.gmra.mrb[2].mxu0 %v3799_v28  ;;  %v3072_v20 = vpack.c.bf16 %v1120_v13, %v1119_v11  ;;  %v3042_v21 = vpack.c.bf16 %v1106_v15, %v1105_v14  ;;  %v3092_v9 = vpack.c.bf16 %v1363_v5, %v1362_v4  ;;  %v1364_v11 = vld [vmem:[%s3611_s2 + $0x20] sm:$0xff]  ;;  %v1382_v13 = vld [vmem:[%s3611_s2 + $0xb0] sm:$0xff]  ;;  %v1383_v14 = vld [vmem:[%s3611_s2 + $0xb8] sm:$0xff] }
  0x86   : > { %3025 = vmatpush3.bf16.msra.mxu0 %v3024_v29  ;;  %1284 = vmatprep.mubr.f32.mxu0 %v724_v42  ;;  %v1122_v29 = vld [vmem:[%s3606_s14 + $0x258] sm:$0xff]  ;;  %v1109_v42 = vld [vmem:[%s3606_s14 + $0x1f0] sm:$0xff]  ;;  %v3098_v16 = vpack.c.bf16 %v1383_v14, %v1382_v13  ;;  %v1413_v4 = vld [vmem:[%s3611_s2 + $0x1a8] sm:$0xff] }
  0x87   : > { %1215 = vmatmul.mubr.f32.vlgmr.msra.gmra.mrb[2].mxu1 %v721_v30  ;;  %3027 = vmatprep.subr.bf16.mxu0 %v3026_v32  ;;  %v1107_v30 = vld [vmem:[%s3606_s14 + $0x1e0] sm:$0xff]  ;;  %v3076_v35 = vpack.c.bf16 %v1122_v29, %v1121_v25  ;;  %v1366_v17 = vld [vmem:[%s3611_s2 + $0x30] sm:$0xff]  ;;  %v1375_v54 = vld [vmem:[%s3611_s2 + $0x78] sm:$0xff] }
  0x88   : > { %3057 = vmatpush3.bf16.msra.mxu1 %v3056_v31  ;;  %1354 = vmatprep.mubr.f32.mxu1 %v726_v44  ;;  %v1108_v31 = vld [vmem:[%s3606_s14 + $0x1e8] sm:$0xff]  ;;  %v1139_v32 = vld [vmem:[%s3606_s14 + $0x2e0] sm:$0xff]  ;;  %v1141_v44 = vld [vmem:[%s3606_s14 + $0x2f0] sm:$0xff] }
  0x89   : > { %3059 = vmatprep.subr.bf16.mxu1 %v3058_v36  ;;  %v3046_v36 = vpack.c.bf16 %v1108_v31, %v1107_v30  ;;  %v3078_v40 = vpack.c.bf16 %v1140_v33, %v1139_v32  ;;  %v1368_v25 = vld [vmem:[%s3611_s2 + $0x40] sm:$0xff]  ;;  %v1386_v29 = vld [vmem:[%s3611_s2 + $0xd0] sm:$0xff]  ;;  %v1387_v30 = vld [vmem:[%s3611_s2 + $0xd8] sm:$0xff] }
  0x8a   : > { %3029 = vmatpush3.bf16.msra.mxu0 %v3028_v43  ;;  %v1110_v43 = vld [vmem:[%s3606_s14 + $0x1f8] sm:$0xff]  ;;  %v3106_v32 = vpack.c.bf16 %v1387_v30, %v1386_v29  ;;  %v1370_v33 = vld [vmem:[%s3611_s2 + $0x50] sm:$0xff]  ;;  %v1424_v5 = vld [vmem:[%s3611_s2 + $0x200] sm:$0xff] }
  0x8b   : > { %3031 = vmatprep.subr.bf16.mxu0 %v3030_v46  ;;  %v3048_v46 = vpack.c.bf16 %v1092_v38, %v1091_v37  ;;  %v3050_v48 = vpack.c.bf16 %v1110_v43, %v1109_v42  ;;  %v1389_v37 = vld [vmem:[%s3611_s2 + $0xe8] sm:$0xff]  ;;  %v1408_v42 = vld [vmem:[%s3611_s2 + $0x180] sm:$0xff]  ;;  %v1443_v13 = vld [vmem:[%s3611_s2 + $0x298] sm:$0xff] }
  0x8c   : > { %3061 = vmatpush3.bf16.msra.mxu1 %v3060_v45  ;;  %v1142_v45 = vld [vmem:[%s3606_s14 + $0x2f8] sm:$0xff]  ;;  %v1409_v43 = vld [vmem:[%s3611_s2 + $0x188] sm:$0xff]  ;;  %v1414_v14 = vld [vmem:[%s3611_s2 + $0x1b0] sm:$0xff] }
  0x8d   : > { %3063 = vmatprep.subr.bf16.mxu1 %v3062_v52  ;;  %v1094_v52 = vld [vmem:[%s3606_s14 + $0x178] sm:$0xff]  ;;  %v3082_v53 = vpack.c.bf16 %v1142_v45, %v1141_v44  ;;  %v3118_v44 = vpack.c.bf16 %v1409_v43, %v1408_v42  ;;  %v1392_v45 = vld [vmem:[%s3611_s2 + $0x100] sm:$0xff] }
  0x8e   : > { %3033 = vmatpush3.bf16.msra.mxu0 %v3032_v58  ;;  %v3052_v56 = vpack.c.bf16 %v1094_v52, %v1093_v50  ;;  %v723_v58 = vld [vmem:[%s3582_s27 + $0x10] sm:$0xff]  ;;  %v1391_v50 = vld [vmem:[%s3611_s2 + $0xf8] sm:$0xff] }
  0x8f   : > { %3035 = vmatprep.subr.bf16.mxu0 %v3034_v60  ;;  %v1376_v60 = vld [vmem:[%s3611_s2 + $0x80] sm:$0xff] }
  0x90   : > { %3065 = vmatpush3.bf16.msra.mxu1 %v3064_v59  ;;  %v725_v59 = vld [vmem:[%s3582_s27 + $0x20] sm:$0xff]  ;;  %v3086_v62 = vpack.c.bf16 %v1377_v61, %v1376_v60  ;;  %v1395_v60 = vld [vmem:[%s3611_s2 + $0x118] sm:$0xff] }
  0x91   : > { %3067 = vmatprep.subr.bf16.mxu1 %v3066_v0  ;;  %v1361_v0 = vld [vmem:[%s3611_s2 + $0x8] sm:$0xff] }
  0x92   : > { %3037 = vmatpush3.bf16.msra.mxu0 %v3036_v6  ;;  %v3088_v2 = vpack.c.bf16 %v1361_v0, %v1360_v63  ;;  %v3090_v6 = vpack.c.bf16 %v1379_v3, %v1378_v1  ;;  %v1441_v63 = vld [vmem:[%s3611_s2 + $0x288] sm:$0xff]  ;;  %v1412_v3 = vld [vmem:[%s3611_s2 + $0x1a0] sm:$0xff] }
  0x93   : > { %3039 = vmatprep.subr.bf16.mxu0 %v3038_v8  ;;  %v1381_v8 = vld [vmem:[%s3611_s2 + $0xa8] sm:$0xff] }
  0x94   : > { %3069 = vmatpush3.bf16.msra.mxu1 %v3068_v7  ;;  %v1380_v7 = vld [vmem:[%s3611_s2 + $0xa0] sm:$0xff]  ;;  %v728_v0 = vld [vmem:[%s3587_s19 + $0x8] sm:$0xff] }
  0x95   : > { %3071 = vmatprep.subr.bf16.mxu1 %v3070_v12  ;;  %v3094_v10 = vpack.c.bf16 %v1381_v8, %v1380_v7  ;;  %v1365_v12 = vld [vmem:[%s3611_s2 + $0x28] sm:$0xff]  ;;  %v3126_v7 = vpack.c.bf16 %v1413_v4, %v1412_v3  ;;  %v1423_v3 = vld [vmem:[%s3611_s2 + $0x1f8] sm:$0xff] }
  0x96   : > { %3041 = vmatpush3.bf16.msra.mxu0 %v3040_v19  ;;  %v3096_v15 = vpack.c.bf16 %v1365_v12, %v1364_v11  ;;  %v1367_v19 = vld [vmem:[%s3611_s2 + $0x38] sm:$0xff]  ;;  %v1442_v11 = vld [vmem:[%s3611_s2 + $0x290] sm:$0xff] }
  0x97   : > { %3043 = vmatprep.subr.bf16.mxu0 %v3042_v21  ;;  %v1385_v21 = vld [vmem:[%s3611_s2 + $0xc8] sm:$0xff]  ;;  %v3100_v23 = vpack.c.bf16 %v1367_v19, %v1366_v17  ;;  %v1426_v19 = vld [vmem:[%s3611_s2 + $0x210] sm:$0xff] }
  0x98   : > { %3073 = vmatpush3.bf16.msra.mxu1 %v3072_v20  ;;  %v1384_v20 = vld [vmem:[%s3611_s2 + $0xc0] sm:$0xff] }
  0x99   : > { %3075 = vmatprep.subr.bf16.mxu1 %v3074_v26  ;;  %v3102_v24 = vpack.c.bf16 %v1385_v21, %v1384_v20  ;;  %v1369_v26 = vld [vmem:[%s3611_s2 + $0x48] sm:$0xff]  ;;  %v1427_v20 = vld [vmem:[%s3611_s2 + $0x218] sm:$0xff]  ;;  %v1398_v21 = vld [vmem:[%s3611_s2 + $0x130] sm:$0xff] }
  0x9a   : > { %3045 = vmatpush3.bf16.msra.mxu0 %v3044_v34  ;;  %v3104_v31 = vpack.c.bf16 %v1369_v26, %v1368_v25  ;;  %v1371_v34 = vld [vmem:[%s3611_s2 + $0x58] sm:$0xff]  ;;  %v1444_v25 = vld [vmem:[%s3611_s2 + $0x2a0] sm:$0xff]  ;;  %v1445_v26 = vld [vmem:[%s3611_s2 + $0x2a8] sm:$0xff] }
  0x9b   : > { %3047 = vmatprep.subr.bf16.mxu0 %v3046_v36  ;;  %v1388_v36 = vld [vmem:[%s3611_s2 + $0xe0] sm:$0xff]  ;;  %v3158_v30 = vpack.c.bf16 %v1445_v26, %v1444_v25  ;;  %v1438_v25 = vld [vmem:[%s3611_s2 + $0x270] sm:$0xff]  ;;  %v1439_v26 = vld [vmem:[%s3611_s2 + $0x278] sm:$0xff] }
  0x9c   : > { %3077 = vmatpush3.bf16.msra.mxu1 %v3076_v35  ;;  %v3108_v35 = vpack.c.bf16 %v1371_v34, %v1370_v33  ;;  %v3110_v38 = vpack.c.bf16 %v1389_v37, %v1388_v36  ;;  %v1428_v33 = vld [vmem:[%s3611_s2 + $0x220] sm:$0xff]  ;;  %v1401_v37 = vld [vmem:[%s3611_s2 + $0x148] sm:$0xff] }
  0x9d   : > { %3079 = vmatprep.subr.bf16.mxu1 %v3078_v40  ;;  %v1373_v40 = vld [vmem:[%s3611_s2 + $0x68] sm:$0xff]  ;;  %v1400_v36 = vld [vmem:[%s3611_s2 + $0x140] sm:$0xff] }
  0x9e   : > { %3049 = vmatpush3.bf16.msra.mxu0 %v3048_v46  ;;  %v3112_v41 = vpack.c.bf16 %v1373_v40, %v1372_v39  ;;  %v1393_v46 = vld [vmem:[%s3611_s2 + $0x108] sm:$0xff]  ;;  %v1446_v39 = vld [vmem:[%s3611_s2 + $0x2b0] sm:$0xff]  ;;  %v1447_v40 = vld [vmem:[%s3611_s2 + $0x2b8] sm:$0xff]  ;;  %v3136_v42 = vpack.c.bf16 %v1401_v37, %v1400_v36 }
  0x9f   : > { %3051 = vmatprep.subr.bf16.mxu0 %v3050_v48  ;;  %v1390_v48 = vld [vmem:[%s3611_s2 + $0xf0] sm:$0xff]  ;;  %v3162_v43 = vpack.c.bf16 %v1447_v40, %v1446_v39  ;;  %v2552_v36 = vld [vmem:[%s4216_s4] ss:$0 sm:$0xff] }
  0xa0   : > { %3081 = vmatpush3.bf16.msra.mxu1 %v3080_v47  ;;  %v3120_v47 = vpack.c.bf16 %v1393_v46, %v1392_v45  ;;  %v3114_v52 = vpack.c.bf16 %v1391_v50, %v1390_v48  ;;  %v1430_v45 = vld [vmem:[%s3611_s2 + $0x230] sm:$0xff]  ;;  %v1431_v46 = vld [vmem:[%s3611_s2 + $0x238] sm:$0xff] }
  0xa1   : > { %3083 = vmatprep.subr.bf16.mxu1 %v3082_v53  ;;  %v1374_v53 = vld [vmem:[%s3611_s2 + $0x70] sm:$0xff]  ;;  %v1403_v50 = vld [vmem:[%s3611_s2 + $0x158] sm:$0xff] }
  0xa2   : > { %3053 = vmatpush3.bf16.msra.mxu0 %v3052_v56  ;;  %v3116_v55 = vpack.c.bf16 %v1375_v54, %v1374_v53  ;;  %v1410_v56 = vld [vmem:[%s3611_s2 + $0x190] sm:$0xff]  ;;  %v1449_v53 = vld [vmem:[%s3611_s2 + $0x2c8] sm:$0xff]  ;;  %v1420_v54 = vld [vmem:[%s3611_s2 + $0x1e0] sm:$0xff] }
  0xa3   : > { %3087 = vmatprep.subr.bf16.mxu0 %v3086_v62  ;;  %v1440_v62 = vld [vmem:[%s3611_s2 + $0x280] sm:$0xff]  ;;  %v1402_v48 = vld [vmem:[%s3611_s2 + $0x150] sm:$0xff] }
  0xa4   : > { %3085 = vmatpush3.bf16.msra.mxu1 %v3084_v57  ;;  %v1411_v57 = vld [vmem:[%s3611_s2 + $0x198] sm:$0xff]  ;;  %v3150_v1 = vpack.c.bf16 %v1441_v63, %v1440_v62  ;;  %v1405_v63 = vld [vmem:[%s3611_s2 + $0x168] sm:$0xff] }
  0xa5   : > { %1285 = vmatmul.mubr.f32.vlgmr.msra.gmra.mrb[4].mxu0 %v723_v58  ;;  %3119 = vmatprep.subr.bf16.mxu1 %v3118_v44  ;;  %v3122_v58 = vpack.c.bf16 %v1411_v57, %v1410_v56  ;;  %v1419_v44 = vld [vmem:[%s3611_s2 + $0x1d8] sm:$0xff]  ;;  %v3164_v56 = vpack.c.bf16 %v1431_v46, %v1430_v45  ;;  %v3140_v57 = vpack.c.bf16 %v1403_v50, %v1402_v48 }
  0xa6   : > { %3089 = vmatpush3.bf16.msra.mxu0 %v3088_v2  ;;  %v727_v2 = vld [vmem:[%s3587_s19] sm:$0xff]  ;;  %1527 = vmatprep.mubr.f32.mxu0 %v728_v0  ;;  %v1450_v0 = vld [vmem:[%s3611_s2 + $0x2d0] sm:$0xff] }
  0xa7   : > { %1355 = vmatmul.mubr.f32.vlgmr.msra.gmra.mrb[4].mxu1 %v725_v59  ;;  %3091 = vmatprep.subr.bf16.mxu0 %v3090_v6  ;;  %v1394_v59 = vld [vmem:[%s3611_s2 + $0x110] sm:$0xff]  ;;  %v1425_v6 = vld [vmem:[%s3611_s2 + $0x208] sm:$0xff] }
  0xa8   : > { %3121 = vmatpush3.bf16.msra.mxu1 %v3120_v47  ;;  %v3124_v61 = vpack.c.bf16 %v1395_v60, %v1394_v59  ;;  %v3152_v8 = vpack.c.bf16 %v1425_v6, %v1424_v5  ;;  %v1432_v59 = vld [vmem:[%s3611_s2 + $0x240] sm:$0xff]  ;;  %v1433_v60 = vld [vmem:[%s3611_s2 + $0x248] sm:$0xff] }
  0xa9   : > { %3123 = vmatprep.subr.bf16.mxu1 %v3122_v58  ;;  %v3168_v4 = vpack.c.bf16 %v1433_v60, %v1432_v59 }
  0xaa   : > { %3093 = vmatpush3.bf16.msra.mxu0 %v3092_v9  ;;  %v1396_v9 = vld [vmem:[%s3611_s2 + $0x120] sm:$0xff] }
  0xab   : > { %3095 = vmatprep.subr.bf16.mxu0 %v3094_v10  ;;  %v1397_v10 = vld [vmem:[%s3611_s2 + $0x128] sm:$0xff] }
  0xac   : > { %3125 = vmatpush3.bf16.msra.mxu1 %v3124_v61  ;;  %v3128_v12 = vpack.c.bf16 %v1397_v10, %v1396_v9  ;;  %v1404_v61 = vld [vmem:[%s3611_s2 + $0x160] sm:$0xff]  ;;  %v1406_v10 = vld [vmem:[%s3611_s2 + $0x170] sm:$0xff] }
  0xad   : > { %3127 = vmatprep.subr.bf16.mxu1 %v3126_v7  ;;  %v3144_v5 = vpack.c.bf16 %v1405_v63, %v1404_v61  ;;  %v1434_v7 = vld [vmem:[%s3611_s2 + $0x250] sm:$0xff] }
  0xae   : > { %3097 = vmatpush3.bf16.msra.mxu0 %v3096_v15  ;;  %v1415_v15 = vld [vmem:[%s3611_s2 + $0x1b8] sm:$0xff] }
  0xaf   : > { %3099 = vmatprep.subr.bf16.mxu0 %v3098_v16  ;;  %v3154_v16 = vpack.c.bf16 %v1443_v13, %v1442_v11  ;;  %v3130_v17 = vpack.c.bf16 %v1415_v15, %v1414_v14  ;;  %v1407_v11 = vld [vmem:[%s3611_s2 + $0x178] sm:$0xff]  ;;  %v1452_v14 = vld [vmem:[%s3611_s2 + $0x2e0] sm:$0xff]  ;;  %v1453_v15 = vld [vmem:[%s3611_s2 + $0x2e8] sm:$0xff] }
  0xb0   : > { %3129 = vmatpush3.bf16.msra.mxu1 %v3128_v12  ;;  %v3148_v13 = vpack.c.bf16 %v1407_v11, %v1406_v10 }
  0xb1   : > { %3131 = vmatprep.subr.bf16.mxu1 %v3130_v17  ;;  %v1436_v17 = vld [vmem:[%s3611_s2 + $0x260] sm:$0xff] }
  0xb2   : > { %3101 = vmatpush3.bf16.msra.mxu0 %v3100_v23  ;;  %v3156_v23 = vpack.c.bf16 %v1427_v20, %v1426_v19  ;;  %v1437_v19 = vld [vmem:[%s3611_s2 + $0x268] sm:$0xff] }
  0xb3   : > { %3103 = vmatprep.subr.bf16.mxu0 %v3102_v24  ;;  %v1399_v24 = vld [vmem:[%s3611_s2 + $0x138] sm:$0xff]  ;;  %v3176_v20 = vpack.c.bf16 %v1437_v19, %v1436_v17 }
  0xb4   : > { %v3132_v29 = vpack.c.bf16 %v1399_v24, %v1398_v21  ;;  %v1454_v21 = vld [vmem:[%s3611_s2 + $0x2f0] sm:$0xff] }
  0xb6   : > { %3105 = vmatpush3.bf16.msra.mxu0 %v3104_v31  ;;  %v1416_v31 = vld [vmem:[%s3611_s2 + $0x1c0] sm:$0xff]  ;;  %3133 = vmatpush3.bf16.msra.mxu1 %v3132_v29  ;;  %v3180_v29 = vpack.c.bf16 %v1439_v26, %v1438_v25  ;;  %v1846_v25 = vld [vmem:[%s3626_s28 + $0x8] sm:$0xff]  ;;  %v1852_v26 = vld [vmem:[%s3626_s28 + $0x38] sm:$0xff] }
  0xb7   : > { %3107 = vmatprep.subr.bf16.mxu0 %v3106_v32  ;;  %v1417_v32 = vld [vmem:[%s3611_s2 + $0x1c8] sm:$0xff] }
  0xb8   : > { %v3134_v34 = vpack.c.bf16 %v1417_v32, %v1416_v31  ;;  %v729_v31 = vld [vmem:[%s3587_s19 + $0x10] sm:$0xff]  ;;  %v732_v32 = vld [vmem:[%s3587_s19 + $0x28] sm:$0xff] }
  0xba   : > { %3109 = vmatpush3.bf16.msra.mxu0 %v3108_v35  ;;  %v1429_v35 = vld [vmem:[%s3611_s2 + $0x228] sm:$0xff]  ;;  %3135 = vmatprep.subr.bf16.mxu1 %v3134_v34  ;;  %v731_v34 = vld [vmem:[%s3587_s19 + $0x20] sm:$0xff] }
  0xbb   : > { %3111 = vmatprep.subr.bf16.mxu0 %v3110_v38  ;;  %v3160_v38 = vpack.c.bf16 %v1429_v35, %v1428_v33  ;;  %3137 = vmatpush3.bf16.msra.mxu1 %v3136_v42  ;;  %v3413_v33 = vmov 0.0  }
  0xbe   : > { %3113 = vmatpush3.bf16.msra.mxu0 %v3112_v41  ;;  %v1418_v41 = vld [vmem:[%s3611_s2 + $0x1d0] sm:$0xff] }
  0xbf   : > { %3115 = vmatprep.subr.bf16.mxu0 %v3114_v52  ;;  %v3138_v47 = vpack.c.bf16 %v1419_v44, %v1418_v41  ;;  %v1448_v52 = vld [vmem:[%s3611_s2 + $0x2c0] sm:$0xff] }
  0xc0   : > { %v3166_v58 = vpack.c.bf16 %v1449_v53, %v1448_v52 }
  0xc1   : > { %3139 = vmatprep.subr.bf16.mxu1 %v3138_v47 }
  0xc2   : > { %3117 = vmatpush3.bf16.msra.mxu0 %v3116_v55  ;;  %v1421_v55 = vld [vmem:[%s3611_s2 + $0x1e8] sm:$0xff]  ;;  %3141 = vmatpush3.bf16.msra.mxu1 %v3140_v57 }
  0xc3   : > { %3151 = vmatprep.subr.bf16.mxu0 %v3150_v1  ;;  %v3142_v62 = vpack.c.bf16 %v1421_v55, %v1420_v54  ;;  %v1451_v1 = vld [vmem:[%s3611_s2 + $0x2d8] sm:$0xff] }
  0xc4   : > { %v3170_v6 = vpack.c.bf16 %v1451_v1, %v1450_v0 }
  0xc5   : > { %1528 = vmatmul.mubr.f32.vlgmr.msra.gmra.mrb[6].mxu0 %v727_v2  ;;  %v1422_v2 = vld [vmem:[%s3611_s2 + $0x1f0] sm:$0xff]  ;;  %3143 = vmatprep.subr.bf16.mxu1 %v3142_v62 }
  0xc6   : > { %3153 = vmatpush3.bf16.msra.mxu0 %v3152_v8  ;;  %v1435_v8 = vld [vmem:[%s3611_s2 + $0x258] sm:$0xff]  ;;  %v3146_v9 = vpack.c.bf16 %v1423_v3, %v1422_v2  ;;  %3145 = vmatpush3.bf16.msra.mxu1 %v3144_v5  ;;  %v2554_v3 = vld [vmem:[%s687_s10] ss:$0 sm:$0xff] }
  0xc7   : > { %3155 = vmatprep.subr.bf16.mxu0 %v3154_v16  ;;  %v3172_v12 = vpack.c.bf16 %v1435_v8, %v1434_v7  ;;  %v3174_v16 = vpack.c.bf16 %v1453_v15, %v1452_v14  ;;  %1667 = vmatprep.mubr.f32.mxu0 %v732_v32 }
  0xc8   : > { %3147 = vmatprep.subr.bf16.mxu1 %v3146_v9 }
  0xca   : > { %3157 = vmatpush3.bf16.msra.mxu0 %v3156_v23  ;;  %3149 = vmatpush3.bf16.msra.mxu1 %v3148_v13  ;;  %v1455_v23 = vld [vmem:[%s3611_s2 + $0x2f8] sm:$0xff]  ;;  %v1750_v13 = vld [vmem:[%s3621_s21] sm:$0xff] }
  0xcb   : > { %3159 = vmatprep.subr.bf16.mxu0 %v3158_v30  ;;  %v3178_v24 = vpack.c.bf16 %v1455_v23, %v1454_v21  ;;  %v730_v30 = vld [vmem:[%s3587_s19 + $0x18] sm:$0xff]  ;;  %2884 = vmatprep.subr.mxu1 %v3413_v33  ;;  %s4217_s19 = scalar_lea.vmem %s4157_s7, %s3572_s29  ;;  %vm1751_vm2 = vcmp.ne.f32.partialorder %v1750_v13, 0.0 }
  0xcc   : > { %1597 = vmatprep.mubr.f32.mxu1 %v730_v30  ;;  %v2553_v53 = vld [vmem:[%s4217_s19] ss:$0 sm:$0xff]  ;;  %v1850_v30 = vld [vmem:[%s3626_s28 + $0x28] sm:$0xff] }
  0xcd   : > { %1598 = vmatmul.mubr.f32.vlgmr.msra.gmra.mrb[6].mxu1 %v729_v31  ;;  %v1856_v31 = vld [vmem:[%s3626_s28 + $0x58] sm:$0xff] }
  0xce   : > { %3161 = vmatpush3.bf16.msra.mxu0 %v3160_v38  ;;  %2886 = vmatprep.mubr.msk.f32.mxu1 %vm3414_vm0, %v3413_v33  ;;  %v3214_v32 = vpack.c.bf16 %v1856_v31, %v1850_v30  ;;  %v1859_v30 = vld [vmem:[%s3626_s28 + $0x70] sm:$0xff]  ;;  %v1865_v31 = vld [vmem:[%s3626_s28 + $0xa0] sm:$0xff] }
  0xcf   : > { %3163 = vmatprep.subr.bf16.mxu0 %v3162_v43 }
  0xd2   : > { %3165 = vmatpush3.bf16.msra.mxu0 %v3164_v56 }
  0xd3   : > { %3167 = vmatprep.subr.bf16.mxu0 %v3166_v58 }
  0xd6   : > { %3169 = vmatpush3.bf16.msra.mxu0 %v3168_v4 }
  0xd7   : > { %3171 = vmatprep.subr.bf16.mxu0 %v3170_v6 }
  0xda   : > { %3173 = vmatpush3.bf16.msra.mxu0 %v3172_v12 }
  0xdb   : > { %3175 = vmatprep.subr.bf16.mxu0 %v3174_v16 }
  0xde   : > { %3177 = vmatpush3.bf16.msra.mxu0 %v3176_v20 }
  0xdf   : > { %3179 = vmatprep.subr.bf16.mxu0 %v3178_v24 }
  0xe2   : > { %3181 = vmatpush3.bf16.msra.mxu0 %v3180_v29  ;;  %v3182_v29 = vpack.c.bf16 %v1852_v26, %v1846_v25  ;;  %v1866_v25 = vld [vmem:[%s3626_s28 + $0xa8] sm:$0xff] }
  0xe3   : > { %3215 = vmatprep.subr.bf16.mxu0 %v3214_v32 }
  0xe5   : > { %1668 = vmatmul.mubr.f32.vlgmr.msra.gmra.mrb[8].mxu0 %v731_v34  ;;  %v1849_v34 = vld [vmem:[%s3626_s28 + $0x20] sm:$0xff] }
  0xe6   : > { %2102 = vmatprep.mubr.f32.mxu0 %v3413_v33 }
 0x138   : > { %v2597_v35 = vpop.f32.mrb[0].mxu0 }
 0x139   : > { %v2598_v37 = vpop.f32.mrb[1].mxu0 }
 0x13a   : > { %v2632_v38 = vpop.f32.mrb[0].mxu1  ;;  %v2599_v39 = vadd.f32 %v2598_v37, %v2597_v35  ;;  %v1855_v35 = vld [vmem:[%s3626_s28 + $0x50] sm:$0xff]  ;;  %v1862_v37 = vld [vmem:[%s3626_s28 + $0x88] sm:$0xff] }
 0x13b   : > { %v2633_v40 = vpop.f32.mrb[1].mxu1 }
 0x13c   : > { %v2634_v41 = vadd.f32 %v2633_v40, %v2632_v38  ;;  %v903_v42 = vadd.f32 %v2599_v39, %v2552_v36  ;;  %v3216_v36 = vpack.c.bf16 %v1855_v35, %v1849_v34  ;;  %v1868_v38 = vld [vmem:[%s3626_s28 + $0xb8] sm:$0xff]  ;;  %v1861_v39 = vld [vmem:[%s3626_s28 + $0x80] sm:$0xff]  ;;  %v1878_v35 = vld [vmem:[%s3626_s28 + $0x108] sm:$0xff] }
 0x13d   : > { %v3218_v40 = vpack.c.bf16 %v1868_v38, %v1862_v37  ;;  %v1872_v34 = vld [vmem:[%s3626_s28 + $0xd8] sm:$0xff]  ;;  %v3204_v37 = vpack.c.bf16 %v1865_v31, %v1859_v30 }
 0x13e   : > { %v973_v43 = vadd.f32 %v2634_v41, %v903_v42  ;;  %3217 = vmatpush1.bf16.msra.mxu0 %v3216_v36  ;;  %v1867_v41 = vld [vmem:[%s3626_s28 + $0xb0] sm:$0xff]  ;;  %v3206_v38 = vpack.c.bf16 %v1878_v35, %v1872_v34 }
 0x13f   : > { %v3220_v42 = vpack.c.bf16 %v1867_v41, %v1861_v39  ;;  %3219 = vmatprep.subr.bf16.mxu0 %v3218_v40  ;;  %v1871_v39 = vld [vmem:[%s3626_s28 + $0xd0] sm:$0xff]  ;;  %v1877_v40 = vld [vmem:[%s3626_s28 + $0x100] sm:$0xff]  ;;  %v1884_v41 = vld [vmem:[%s3626_s28 + $0x138] sm:$0xff] }
 0x142   : > { %3221 = vmatpush1.bf16.msra.mxu0 %v3220_v42  ;;  %v1890_v42 = vld [vmem:[%s3626_s28 + $0x168] sm:$0xff] }
 0x158   : > { %v2667_v44 = vpop.f32.mrb[2].mxu0 }
 0x159   : > { %v2668_v45 = vpop.f32.mrb[3].mxu0 }
 0x15a   : > { %v2702_v46 = vpop.f32.mrb[2].mxu1  ;;  %v2669_v47 = vadd.f32 %v2668_v45, %v2667_v44  ;;  %v1880_v44 = vld [vmem:[%s3626_s28 + $0x118] sm:$0xff]  ;;  %v1873_v45 = vld [vmem:[%s3626_s28 + $0xe0] sm:$0xff] }
 0x15b   : > { %v2703_v48 = vpop.f32.mrb[3].mxu1 }
 0x15c   : > { %v2704_v50 = vadd.f32 %v2703_v48, %v2702_v46  ;;  %v1043_v52 = vadd.f32 %v2669_v47, %v973_v43  ;;  %v1874_v43 = vld [vmem:[%s3626_s28 + $0xe8] sm:$0xff]  ;;  %v1879_v47 = vld [vmem:[%s3626_s28 + $0x110] sm:$0xff] }
 0x15d   : > { %v3222_v46 = vpack.c.bf16 %v1880_v44, %v1874_v43  ;;  %v3224_v48 = vpack.c.bf16 %v1879_v47, %v1873_v45  ;;  %v3208_v43 = vpack.c.bf16 %v1877_v40, %v1871_v39  ;;  %v3210_v44 = vpack.c.bf16 %v1890_v42, %v1884_v41  ;;  %v1883_v45 = vld [vmem:[%s3626_s28 + $0x130] sm:$0xff] }
 0x15e   : > { %v1217_v57 = vadd.f32 %v2704_v50, %v2553_v53  ;;  %v1046_v63 = vmul.f32 0.125, %v1043_v52  ;;  %v1886_v50 = vld [vmem:[%s3626_s28 + $0x148] sm:$0xff]  ;;  %v1892_v52 = vld [vmem:[%s3626_s28 + $0x178] sm:$0xff]  ;;  %v1885_v53 = vld [vmem:[%s3626_s28 + $0x140] sm:$0xff] }
 0x15f   : > { %3223 = vmatprep.subr.bf16.mxu0 %v3222_v46  ;;  %v1889_v46 = vld [vmem:[%s3626_s28 + $0x160] sm:$0xff] }
 0x160   : > { %3225 = vmatpush1.bf16.msra.mxu0 %v3224_v48  ;;  %v3212_v47 = vpack.c.bf16 %v1889_v46, %v1883_v45  ;;  %v1839_v48 = vld [vmem:[#allocation2] sm:$0xff] }
 0x178   : > { %v2737_v54 = vpop.f32.mrb[4].mxu0 }
 0x179   : > { %v2738_v55 = vpop.f32.mrb[5].mxu0 }
 0x17a   : > { %v2772_v56 = vpop.f32.mrb[4].mxu1  ;;  %v2739_v58 = vadd.f32 %v2738_v55, %v2737_v54  ;;  %v3226_v54 = vpack.c.bf16 %v1892_v52, %v1886_v50  ;;  %v1891_v55 = vld [vmem:[%s3626_s28 + $0x170] sm:$0xff]  ;;  %v1840_v50 = vld [vmem:[#allocation2 + $0x8] sm:$0xff] }
 0x17b   : > { %v2773_v59 = vpop.f32.mrb[5].mxu1  ;;  %v1844_v52 = vld [vmem:[#allocation2 + $0x28] sm:$0xff] }
 0x17c   : > { %v2774_v60 = vadd.f32 %v2773_v59, %v2772_v56  ;;  %v1287_v61 = vadd.f32 %v2739_v58, %v1217_v57  ;;  %v3228_v56 = vpack.c.bf16 %v1891_v55, %v1885_v53  ;;  %3227 = vmatprep.subr.bf16.mxu0 %v3226_v54  ;;  %v1845_v58 = vld [vmem:[%s3626_s28] sm:$0xff]  ;;  %v1851_v59 = vld [vmem:[%s3626_s28 + $0x30] sm:$0xff] }
 0x17e   : > { %v1357_v62 = vadd.f32 %v2774_v60, %v1287_v61  ;;  %3229 = vmatpush1.bf16.msra.mxu0 %v3228_v56  ;;  %v1858_v60 = vld [vmem:[%s3626_s28 + $0x68] sm:$0xff]  ;;  %v1864_v61 = vld [vmem:[%s3626_s28 + $0x98] sm:$0xff] }
 0x180   : > { %2885 = vmatpush3.xpose.msk.msra.mxu1 %vm1673_vm1, %v1357_v62 }
 0x181   : > { %2889 = vmatprep.subr.mxu1 %v3413_v33 }
 0x183   : > { %2887 = vmatmul.mubr.msk.f32.vlgmr.msra.gmra.mrb[8].mxu1 %vm1673_vm1, %v1046_v63  ;;  %v3184_v63 = vpack.c.bf16 %v1851_v59, %v1845_v58 }
 0x184   : > { %2891 = vmatprep.mubr.msk.f32.mxu1 %vm3414_vm0, %v3413_v33 }
 0x198   : > { %v2807_v0 = vpop.f32.mrb[6].mxu0 }
 0x199   : > { %v2808_v1 = vpop.f32.mrb[7].mxu0 }
 0x19a   : > { %v2809_v2 = vadd.f32 %v2808_v1, %v2807_v0  ;;  %v3186_v1 = vpack.c.bf16 %v1864_v61, %v1858_v60  ;;  %v1841_v61 = vld [vmem:[#allocation2 + $0x10] sm:$0xff] }
 0x19c   : > { %v1530_v4 = vadd.f32 %v2809_v2, %v2554_v3  ;;  %v1857_v2 = vld [vmem:[%s3626_s28 + $0x60] sm:$0xff]  ;;  %v1863_v3 = vld [vmem:[%s3626_s28 + $0x90] sm:$0xff] }
 0x1a0   : > { %v2842_v5 = vpop.f32.mrb[6].mxu1 }
 0x1a1   : > { %v2843_v6 = vpop.f32.mrb[7].mxu1 }
 0x1a2   : > { %v2844_v7 = vadd.f32 %v2843_v6, %v2842_v5  ;;  %v1876_v5 = vld [vmem:[%s3626_s28 + $0xf8] sm:$0xff]  ;;  %v3188_v6 = vpack.c.bf16 %v1863_v3, %v1857_v2 }
 0x1a4   : > { %v1600_v9 = vadd.f32 %v2844_v7, %v1530_v4  ;;  %v1870_v4 = vld [vmem:[%s3626_s28 + $0xc8] sm:$0xff] }
 0x1a5   : > { %v3190_v7 = vpack.c.bf16 %v1876_v5, %v1870_v4 }
 0x1b8   : > { %v2877_v8 = vpop.f32.mrb[8].mxu0 }
 0x1b9   : > { %v2878_v10 = vpop.f32.mrb[9].mxu0 }
 0x1ba   : > { %v2879_v11 = vadd.f32 %v2878_v10, %v2877_v8  ;;  %v1869_v8 = vld [vmem:[%s3626_s28 + $0xc0] sm:$0xff]  ;;  %v1882_v10 = vld [vmem:[%s3626_s28 + $0x128] sm:$0xff] }
 0x1bc   : > { %v1670_v12 = vadd.f32 %v2879_v11, %v1600_v9  ;;  %v1875_v9 = vld [vmem:[%s3626_s28 + $0xf0] sm:$0xff]  ;;  %v1888_v11 = vld [vmem:[%s3626_s28 + $0x158] sm:$0xff] }
 0x1bd   : > { %v3194_v13 = vpack.c.bf16 %v1888_v11, %v1882_v10 }
 0x1be   : > { %2890 = vmatpush3.msra.mxu1 %v1670_v12  ;;  %v3192_v12 = vpack.c.bf16 %v1875_v9, %v1869_v8 }
 0x1bf   : > { %3183 = vmatprep.subr.bf16.mxu1 %v3182_v29 }
 0x256   : > { %v1746_v14 = vpop.f32.mrb[8].mxu1 }
 0x257   : > { %v1752_v15 = vsel %vm1751_vm2, -1e+09, %v1746_v14  ;;  %v2888_v16 = vpop.f32.mrb[9].mxu1  ;;  %v1881_v14 = vld [vmem:[%s3626_s28 + $0x120] sm:$0xff] }
 0x258   : > { %v1754_v17 = vsel %vm1753_vm3, %v1752_v15, -inf }
 0x259   : > { %1755 = vmax.xlane.f32.xlu0 %v1754_v17  ;;  %v1848_v17 = vld [vmem:[%s3626_s28 + $0x18] sm:$0xff] }
 0x2e6   : > { %v1756_v19 = vpop.xlane.xlu0 %1755 }
 0x2e7   : > { %v1757_v20 = vsub.f32 %v1752_v15, %v1756_v19  ;;  %v1887_v15 = vld [vmem:[%s3626_s28 + $0x150] sm:$0xff]  ;;  %v1854_v19 = vld [vmem:[%s3626_s28 + $0x48] sm:$0xff] }
 0x2e8   : > { %v3196_v16 = vpack.c.bf16 %v1887_v15, %v1881_v14 }
 0x2e9   : > { %v1758_v21 = vmul.f32 1.442695, %v1757_v20  ;;  %v3198_v20 = vpack.c.bf16 %v1854_v19, %v1848_v17 }
 0x2eb   : > { %3310 = vpow2.f32 %v1758_v21  ;;  %v1847_v21 = vld [vmem:[%s3626_s28 + $0x10] sm:$0xff] }
 0x2f5   : > { %v3311_v23 = vpop.eup %3310 }
 0x2f6   : > { %v1760_v24 = vsel %vm1753_vm3, %v3311_v23, 0.0 }
 0x2f7   : > { %1761 = vadd.xlane.f32.xlu0 %v1760_v24  ;;  %v1860_v24 = vld [vmem:[%s3626_s28 + $0x78] sm:$0xff] }
 0x2f8   : > { %v3202_v29 = vpack.c.bf16 %v1866_v25, %v1860_v24 }
 0x384   : > { %v1762_v57 = vpop.xlane.xlu0 %1761 }
 0x385   : > { %3312 = vrcp.f32 %v1762_v57 }
 0x38f   : > { %v3313_v62 = vpop.eup %3312 }
 0x390   : > { %v1764_v0 = vmul.f32 %v3313_v62, %v3311_v23  ;;  %v1853_v23 = vld [vmem:[%s3626_s28 + $0x40] sm:$0xff]  ;;  %v1842_v62 = vld [vmem:[#allocation2 + $0x18] sm:$0xff] }
 0x391   : > { %v3200_v26 = vpack.c.bf16 %v1853_v23, %v1847_v21 }
 0x392   : > { %1765 = vst.msk [vmem:[%s3632_s5] sm:$0xff] %vm1753_vm3, %v1764_v0  ;;  %2892 = vmatmul.mubr.msk.f32.vlgmr.msra.gmra.mrb[10].mxu1 %vm1753_vm3, %v1764_v0  ;;  %s4218_s5 = sld [smem:[#allocation9_spill]] }
 0x393   : > { %3185 = vmatpush1.bf16.msra.mxu1 %v3184_v63  ;;  %1960 = vmatprep.mubr.f32.mxu1 %v3413_v33 }
 0x394   : > { %3187 = vmatprep.subr.bf16.mxu1 %v3186_v1 }
 0x397   : > { %3189 = vmatpush1.bf16.msra.mxu1 %v3188_v6 }
 0x398   : > { %3191 = vmatprep.subr.bf16.mxu1 %v3190_v7  ;;  %p2561_p1 = scmp.ne.s32.totalorder %s4218_s5, 11 }
 0x399   : > { %v2133_v3 = vlaneseq (!%p2561_p1)  ;;  %s4219_s20 = sld [smem:[#allocation26_spill]] (!%p2561_p1)  ;;  %s4220_s12 = sld [smem:[#allocation27_spill]] (!%p2561_p1) }
 0x39a   : > { %s4221_s1 = sld [smem:[#allocation28_spill]] (!%p2561_p1) }
 0x39b   : > { %3193 = vmatpush1.bf16.msra.mxu1 %v3192_v12  ;;  %v2134_v4 = vshrl.u32 (!%p2561_p1), %v2133_v3, 7 }
 0x39c   : > { %3195 = vmatprep.subr.bf16.mxu1 %v3194_v13 }
 0x39d   : > { %v4048_v7 = vsub.s32 (!%p2561_p1), 0, %v2134_v4  ;;  %v4050_v8 = vsub.s32 (!%p2561_p1), 1, %v2134_v4  ;;  %v4052_v9 = vsub.s32 (!%p2561_p1), 2, %v2134_v4  ;;  %v4054_v10 = vsub.s32 (!%p2561_p1), 3, %v2134_v4 }
 0x39e   : > { %v4056_v14 = vsub.s32 (!%p2561_p1), 4, %v2134_v4  ;;  %v4058_v15 = vsub.s32 (!%p2561_p1), 5, %v2134_v4 }
 0x39f   : > { %3197 = vmatpush1.bf16.msra.mxu1 %v3196_v16  ;;  %v2131_v5 = vld [vmem:[%s4219_s20] sm:$0x3f] (!%p2561_p1) }
 0x3a0   : > { %3199 = vmatprep.subr.bf16.mxu1 %v3198_v20  ;;  %v2136_v16 = vrot.slane (!%p2561_p1), %v2131_v5, %v4048_v7  ;;  %v2140_v17 = vrot.slane (!%p2561_p1), %v2131_v5, %v4050_v8  ;;  %v2144_v19 = vrot.slane (!%p2561_p1), %v2131_v5, %v4052_v9  ;;  %v2148_v20 = vrot.slane (!%p2561_p1), %v2131_v5, %v4054_v10 }
 0x3a1   : > { %v2152_v23 = vrot.slane (!%p2561_p1), %v2131_v5, %v4056_v14  ;;  %v2156_v24 = vrot.slane (!%p2561_p1), %v2131_v5, %v4058_v15 }
 0x465   : > { %v1835_v32 = vpop.f32.mrb[10].mxu1 }
 0x466   : > { %v2893_v36 = vpop.f32.mrb[11].mxu1  ;;  %2558 = vmatmul.mubr.msk.f32.vlgmr.msra.gmra.mrb[12].mxu1 %vm1673_vm1, %v1835_v32  ;;  %2560 = vmatmul.mubr.msk.f32.vlgmr.msra.gmra.mrb[10].mxu0 %vm1673_vm1, %v1835_v32 }
 0x467   : > { %3201 = vmatpush1.bf16.msra.mxu1 %v3200_v26  ;;  %2031 = vmatprep.mubr.f32.mxu1 %v3413_v33  ;;  %v1843_v33 = vld [vmem:[#allocation2 + $0x20] sm:$0xff] }
 0x468   : > { %3203 = vmatprep.subr.bf16.mxu1 %v3202_v29 }
 0x46b   : > { %3205 = vmatpush1.bf16.msra.mxu1 %v3204_v37 }
 0x46c   : > { %3207 = vmatprep.subr.bf16.mxu1 %v3206_v38 }
 0x46f   : > { %3209 = vmatpush1.bf16.msra.mxu1 %v3208_v43 }
 0x470   : > { %3211 = vmatprep.subr.bf16.mxu1 %v3210_v44 }
 0x473   : > { %3213 = vmatpush1.bf16.msra.mxu1 %v3212_v47 }
 0x476   : > { %2559 = vmatmul.mubr.msk.f32.vlgmr.msra.gmra.mrb[14].mxu1 %vm1673_vm1, %v1835_v32 }
 0x539   : > { %v1962_v53 = vpop.f32.mrb[12].mxu1  ;;  %v2104_v54 = vpop.f32.mrb[10].mxu0 }
 0x53a   : > { %v2109_v55 = vadd.f32 %v1962_v53, %v1839_v48  ;;  %v2113_v56 = vadd.f32 %v2104_v54, %v1843_v33  ;;  %v1964_v57 = vpop.f32.mrb[13].mxu1  ;;  %v2106_v58 = vpop.f32.mrb[11].mxu0 }
 0x53b   : > { %v2110_v59 = vadd.f32 %v1964_v57, %v1840_v50  ;;  %v2114_v60 = vadd.f32 %v2106_v58, %v1844_v52 }
 0x53c   : > { %2115 = vst [vmem:[#allocation2] sm:$0xff] %v2109_v55  ;;  %2119 = vst [vmem:[#allocation2 + $0x20] sm:$0xff] %v2113_v56 }
 0x53d   : > { %2116 = vst [vmem:[#allocation2 + $0x8] sm:$0xff] %v2110_v59  ;;  %2120 = vst [vmem:[#allocation2 + $0x28] sm:$0xff] %v2114_v60 }
 0x543   : > { %v2125_v6 = vld [vmem:[#allocation2] sm:$0xff] (!%p2561_p1) }
 0x544   : > { %v2126_v11 = vld [vmem:[#allocation2 + $0x8] sm:$0xff] (!%p2561_p1)  ;;  %v2129_v21 = vld [vmem:[#allocation2 + $0x20] sm:$0xff] (!%p2561_p1)  ;;  %v2163_v25 = vadd.f32 (!%p2561_p1), %v2136_v16, %v2125_v6 }
 0x545   : > { %v2164_v26 = vadd.f32 (!%p2561_p1), %v2140_v17, %v2126_v11  ;;  %v2130_v31 = vld [vmem:[#allocation2 + $0x28] sm:$0xff] (!%p2561_p1)  ;;  %v2167_v32 = vadd.f32 (!%p2561_p1), %v2152_v23, %v2129_v21 }
 0x546   : > { %v2169_v34 = vadd.f32 (!%p2561_p1), %v2163_v25, %v3722_v49  ;;  %v2168_v37 = vadd.f32 (!%p2561_p1), %v2156_v24, %v2130_v31 }
 0x547   : > { %2124 = sbr.rel (%p2561_p1) target bundleno = 1700 (0x6a4), region = 84  ;;  %v2170_v35 = vadd.f32 (!%p2561_p1), %v2164_v26, %v3694_v18  ;;  %v2173_v40 = vadd.f32 (!%p2561_p1), %v2167_v32, %v3799_v28 }
 0x548   : > { %v2174_v42 = vadd.f32 (!%p2561_p1), %v2168_v37, %v3755_v27 }
 0x549   : > { %v2033_v63 = vpop.f32.mrb[14].mxu1  ;;  %v2175_v39 = vadd.f32 (!%p2561_p1), %v2170_v35, %v2169_v34 }
 0x54a   : > { %v2111_v0 = vadd.f32 %v2033_v63, %v1841_v61  ;;  %v2035_v1 = vpop.f32.mrb[15].mxu1  ;;  %v2212_v63 = vld [vmem:[%s4220_s12] sm:$0x3f] (!%p2561_p1) }
 0x54b   : > { %v2112_v2 = vadd.f32 %v2035_v1, %v1842_v62  ;;  %v2217_v1 = vrot.slane (!%p2561_p1), %v2212_v63, %v4048_v7  ;;  %v2225_v3 = vrot.slane (!%p2561_p1), %v2212_v63, %v4052_v9  ;;  %v2229_v4 = vrot.slane (!%p2561_p1), %v2212_v63, %v4054_v10 }
 0x54c   : > { %2117 = vst [vmem:[#allocation2 + $0x10] sm:$0xff] %v2111_v0  ;;  %v2250_v0 = vld [vmem:[%s4221_s1] sm:$0x3f] (!%p2561_p1)  ;;  %v2233_v5 = vrot.slane (!%p2561_p1), %v2212_v63, %v4056_v14  ;;  %v2237_v6 = vrot.slane (!%p2561_p1), %v2212_v63, %v4058_v15 }
 0x54d   : > { %2118 = vst [vmem:[#allocation2 + $0x18] sm:$0xff] %v2112_v2  ;;  %v2221_v2 = vrot.slane (!%p2561_p1), %v2212_v63, %v4050_v8  ;;  %v2263_v16 = vrot.slane (!%p2561_p1), %v2250_v0, %v4052_v9  ;;  %v2267_v17 = vrot.slane (!%p2561_p1), %v2250_v0, %v4054_v10  ;;  %v2271_v24 = vrot.slane (!%p2561_p1), %v2250_v0, %v4056_v14 }
 0x54e   : > { %v2275_v25 = vrot.slane %v2250_v0, %v4058_v15 }
 0x553   : > { %v2127_v12 = vld [vmem:[#allocation2 + $0x10] sm:$0xff] }
 0x554   : > { %v2128_v13 = vld [vmem:[#allocation2 + $0x18] sm:$0xff]  ;;  %v2165_v29 = vadd.f32 %v2144_v19, %v2127_v12  ;;  %v2255_v12 = vrot.slane %v2250_v0, %v4048_v7 }
 0x555   : > { %v2166_v30 = vadd.f32 %v2148_v20, %v2128_v13  ;;  %v2259_v13 = vrot.slane %v2250_v0, %v4050_v8 }
 0x556   : > { %v2171_v36 = vadd.f32 %v2165_v29, %v3725_v51 }
 0x557   : > { %v2172_v38 = vadd.f32 %v2166_v30, %v3700_v22 }
 0x558   : > { %v2176_v41 = vadd.f32 %v2175_v39, %v2171_v36 }
 0x55a   : > { %v2177_v43 = vadd.f32 %v2176_v41, %v2172_v38 }
 0x55c   : > { %v2178_v44 = vadd.f32 %v2177_v43, %v2173_v40 }
 0x55e   : > { %v2179_v45 = vadd.f32 %v2178_v44, %v2174_v42 }
 0x560   : > { %2180 = vadd.xlane.f32.xlu0 %v2179_v45 }
 0x5ed   : > { %v2181_v46 = vpop.xlane.xlu0 %2180 }
 0x5ee   : > { %v2183_v47 = vmul.f32 0.0013020834, %v2181_v46 }
 0x5f0   : > { %v2184_v49 = vsub.f32 %v2169_v34, %v2183_v47  ;;  %v2185_v48 = vsub.f32 %v2170_v35, %v2183_v47  ;;  %v2186_v18 = vsub.f32 %v2171_v36, %v2183_v47  ;;  %v2187_v33 = vsub.f32 %v2172_v38, %v2183_v47 }
 0x5f1   : > { %v2188_v52 = vsub.f32 %v2173_v40, %v2183_v47  ;;  %v2189_v54 = vsub.f32 %v2174_v42, %v2183_v47 }
 0x5f2   : > { %v2190_v51 = vmul.f32 %v2184_v49, %v2184_v49  ;;  %v2191_v50 = vmul.f32 %v2185_v48, %v2185_v48  ;;  %v2192_v22 = vmul.f32 %v2186_v18, %v2186_v18  ;;  %v2193_v28 = vmul.f32 %v2187_v33, %v2187_v33 }
 0x5f3   : > { %v2194_v56 = vmul.f32 %v2188_v52, %v2188_v52  ;;  %v2195_v57 = vmul.f32 %v2189_v54, %v2189_v54 }
 0x5f4   : > { %v2196_v53 = vadd.f32 %v2191_v50, %v2190_v51 }
 0x5f6   : > { %v2197_v55 = vadd.f32 %v2196_v53, %v2192_v22 }
 0x5f8   : > { %v2198_v27 = vadd.f32 %v2197_v55, %v2193_v28 }
 0x5fa   : > { %v2199_v58 = vadd.f32 %v2198_v27, %v2194_v56 }
 0x5fc   : > { %v2200_v59 = vadd.f32 %v2199_v58, %v2195_v57 }
 0x5fe   : > { %2201 = vadd.xlane.f32.xlu0 %v2200_v59 }
 0x68b   : > { %v2202_v60 = vpop.xlane.xlu0 %2201 }
 0x68c   : > { %v2203_v61 = vmul.f32 0.0013020834, %v2202_v60 }
 0x68e   : > { %v2204_v62 = vadd.f32 1e-05, %v2203_v61 }
 0x690   : > { %3314 = vrsqrt.f32 %v2204_v62 }
 0x69a   : > { %v3315_v11 = vpop.eup %3314 }
 0x69b   : > { %v2206_v19 = vmul.f32 %v3315_v11, %v2184_v49  ;;  %v2207_v20 = vmul.f32 %v3315_v11, %v2185_v48  ;;  %v2208_v21 = vmul.f32 %v3315_v11, %v2186_v18  ;;  %v2209_v23 = vmul.f32 %v3315_v11, %v2187_v33 }
 0x69c   : > { %v2210_v26 = vmul.f32 %v3315_v11, %v2188_v52  ;;  %v2211_v29 = vmul.f32 %v3315_v11, %v2189_v54 }
 0x69d   : > { %v2244_v7 = vmul.f32 %v2217_v1, %v2206_v19  ;;  %v2245_v8 = vmul.f32 %v2221_v2, %v2207_v20  ;;  %v2246_v9 = vmul.f32 %v2225_v3, %v2208_v21  ;;  %v2247_v10 = vmul.f32 %v2229_v4, %v2209_v23 }
 0x69e   : > { %v2248_v30 = vmul.f32 %v2233_v5, %v2210_v26  ;;  %v2249_v31 = vmul.f32 %v2237_v6, %v2211_v29 }
 0x69f   : > { %v2282_v32 = vadd.f32 %v2255_v12, %v2244_v7  ;;  %v2283_v34 = vadd.f32 %v2259_v13, %v2245_v8  ;;  %v2284_v35 = vadd.f32 %v2263_v16, %v2246_v9  ;;  %v2285_v14 = vadd.f32 %v2267_v17, %v2247_v10 }
 0x6a0   : > { %v2286_v36 = vadd.f32 %v2271_v24, %v2248_v30  ;;  %v2287_v37 = vadd.f32 %v2275_v25, %v2249_v31 }
 0x6a1   : > { %2288 = vst [vmem:[%s3634_s17] sm:$0xff] %v2282_v32  ;;  %2289 = vst [vmem:[%s3634_s17 + $0x8] sm:$0xff] %v2283_v34 }
 0x6a2   : > { %2290 = vst [vmem:[%s3634_s17 + $0x10] sm:$0xff] %v2284_v35  ;;  %2291 = vst [vmem:[%s3634_s17 + $0x18] sm:$0xff] %v2285_v14 }
 0x6a3   : > { %2292 = vst [vmem:[%s3634_s17 + $0x20] sm:$0xff] %v2286_v36  ;;  %2293 = vst [vmem:[%s3634_s17 + $0x28] sm:$0xff] %v2287_v37 }
 0x6a4 PF: > { %s4222_s28 = sld [smem:[#allocation10_spill]]  ;;  %s4223_s30 = sld [smem:[#allocation7_spill]] }
 0x6a5   : > { %s2317_s26 = sshll.u32 %s3634_s17, 4  ;;  %s4225_s3 = sld [smem:[#allocation29_spill]]  ;;  %s2318_s26 = int_to_ptr.vmem [resolvable:$true] %s2317_s26 }
 0x6a6   : > { %s3316_s19 = scalar_lea.vmem %s2318_s26, 768  ;;  %s3415_s23 = smov [#allocation3]  }
 0x6a7   : > { %p3317_p2 = scmp.ne.s32.totalorder %s2318_s26, %s3316_s19  ;;  %s3320_s25 = sshll.u32 %s3415_s23, 4  ;;  %s3321_s25 = int_to_ptr.vmem [resolvable:$false] %s3320_s25 }
 0x6a8   : > { %s3322_s5 = scalar_lea.vmem %s3321_s25, 1536  ;;  %p3323_p6 = scmp.lt.s32.totalorder %s2318_s26, %s3321_s25 }
 0x6a9   : > { %p3318_p4 = pnand %p3317_p2, %p3545_p3  ;;  %p3324_p7 = scmp.lt.s32.totalorder %s3322_s5, %s3316_s19 }
 0x6aa   : > { %s3235_s16 = smul.u32 768, %s4222_s28  ;;  %s4226_s13 = sand.u32 1, %s4223_s30  }
 0x6ab   : > { %s2295_s18 = scalar_lea.sflag [#allocation4], %s4226_s13  ;;  %p3319_p5 = pneg %p3318_p4 }
 0x6ac   : > { %s4101_s4 = scalar_lea.hbm %s4225_s3, %s3235_s16  ;;  %p3325_p8 = por %p3324_p7, %p3323_p6 }
 0x6ae   : > { %p3326_p10 = pnand %p3325_p8, %p3319_p5 }
 0x6b0   : > { %3329 = shalt.err (!%p3326_p10)
}
 0x6b1   : > { %s3330_s17 = scalar_lea.hbm %s4101_s4, 768  ;;  %s3334_s20 = scalar_lea.hbm %s4225_s3, 1536 }
 0x6b2   : > { %p3331_p11 = scmp.ne.s32.totalorder %s4101_s4, %s3330_s17  ;;  %p3335_p0 = scmp.lt.u32.totalorder %s4101_s4, %s4225_s3 }
 0x6b3   : > { %p3336_p1 = scmp.lt.u32.totalorder %s3334_s20, %s3330_s17  ;;  %p3338_p4 = scmp.lt.u32.totalorder %s3330_s17, %s4101_s4 }
 0x6b4   : > { %p3332_p12 = pnand %p3331_p11, %p3545_p3 }
 0x6b5   : > { %p3337_p2 = por %p3336_p1, %p3335_p0 }
 0x6b6   : > { %p3333_p13 = pneg %p3332_p12 }
 0x6b7   : > { %p3339_p5 = por %p3338_p4, %p3337_p2 }
 0x6b9   : > { %p3340_p6 = pnand %p3339_p5, %p3333_p13 }
 0x6bb   : > { %3343 = shalt.err (!%p3340_p6)
}
 0x6bc   : > { %3236 = dma.vmem_to_hbm [thread:$0]  (%p3545_p3), %s2318_s26, 768, %s4101_s4, %s2295_s18  }
 0x6bd PF: > { %s4227_s12 = sld [smem:[#allocation13_spill]]  ;;  %s4228_s21 = sld [smem:[#allocation6_spill]] }
 0x6c3   : > { %p3242_p7 = scmp.ge.s32.totalorder %s4227_s12, 2  ;;  %s2332_s1 = sand.u32 1, %s4228_s21  }
 0x6c4   : > { %s2333_s28 = scalar_lea.sflag [#allocation4], %s2332_s1 }
 0x6c5   : > { %p3239_p8 = pnand %p3242_p7, %p3555_p9 }
 0x6c7   : > { %3377 = dma.done.wait (!%p3239_p8), %s2333_s28, 768  }
 0x6c8   : > { %3379 = vsyncadd (!%p3239_p8), %s2333_s28, 4294966528  ;;  %s29_s25 = sadd.s32 1, %s4227_s12   ;;  %s4230_s18 = sld [smem:[#allocation7_spill]] }
 0x6c9   : > { %p26_p10 = scmp.ge.s32.totalorder %s29_s25, 26   ;;  %s4231_s19 = sld [smem:[#allocation8_spill]] }
 0x6ca   : > { %s4232_s20 = sld [smem:[#allocation18_spill]]  ;;  %s4233_s21 = sld [smem:[#allocation11_spill]] }
 0x6cb   : > { %s4234_s22 = sld [smem:[#allocation12_spill]]  ;;  %s4235_s23 = sld [smem:[#allocation14_spill]] }
 0x6cc   : > { %s4236_s24 = sld [smem:[#allocation16_spill]]  ;;  %28 = sbr.rel (!%p26_p10) target bundleno = 16 (0x10), region = 161 }
 0x6d3   :  { %2349 = vsyncpa [#allocation4], 1 }
 0x6d4   :  { %2351 = vsyncpa [#allocation4 + $0x1], 1 }

</bundles_post_ra>
